<compile_context>
chip_gen: v5e
topology: v5e:2x2
jax: 0.10.0
libtpu: 0.0.40
codegen_flags: <defaults>
</compile_context>

<pallas_src>
import math
import functools

import jax
import jax.numpy as jnp
from jax import lax
from jax.experimental import pallas as pl
from jax.experimental.pallas import tpu as pltpu


def _round_up(v, m):
    return ((v + m - 1) // m) * m


# ---------------------------------------------------------------------------
# Fused kernel: both nets, all layers, all timesteps.  grid = (net, layer, t)
# ---------------------------------------------------------------------------
def _lstmsa_net_kernel(x_ref, wc_ref, cb_ref, wfh_ref, wfx_ref, fb_ref, pe_ref,
                       mask_ref, hout_ref,
                       h_sc, c_sc, hseq_sc, patch_sc, cross_sc,
                       *, hcp, cinp, hc, batch, H, W, k, scale, n_layers):
    l = pl.program_id(1)
    t = pl.program_id(2)
    n_t = pl.num_programs(2)
    N = H * W
    BN = batch * N
    ccp = cinp + hcp

    # new direction (layer 0, step 0): zero recurrent state (ConvLSTMCell.init_hidden)
    @pl.when(jnp.logical_and(l == 0, t == 0))
    def _():
        h_sc[...] = jnp.zeros_like(h_sc)
        c_sc[...] = jnp.zeros_like(c_sc)

    # the layer input lives in the inter-layer VMEM buffer; layer 0 stages its
    # HBM frame there (padded input channels == padded hidden channels)
    @pl.when(l == 0)
    def _():
        hseq_sc[t] = x_ref[0, 0]

    x = hseq_sc[t]                       # (cinp, B*N) current layer input
    h = h_sc[...]                        # (hcp,  B*N)
    c = c_sc[...]

    # --- cross attention: per-sample softmax((q @ k^T) * scale) @ v, q=v=x, k=h ---
    # padded key columns are masked out so the softmax spans only real channels
    key_mask = jnp.where(
        lax.broadcasted_iota(jnp.int32, (cinp, hcp), 1) < hc,
        0.0, -1e30).astype(jnp.float32)
    for b in range(batch):
        qb = x[:, b * N:(b + 1) * N]
        kb = h[:, b * N:(b + 1) * N]
        energy = lax.dot_general(qb, kb, (((1,), (1,)), ((), ())),
                                 preferred_element_type=jnp.float32) * scale + key_mask
        energy = energy - jnp.max(energy, axis=-1, keepdims=True)
        e = jnp.exp(energy)
        attn = e * pl.reciprocal(jnp.sum(e, axis=-1, keepdims=True), approx=True)
        cross_sc[:, b * N:(b + 1) * N] = jnp.dot(attn, qb,
                                                 preferred_element_type=jnp.float32)

    # --- fusion Linear(cat[h, cross]) + ReLU: two K=hcp bf16 matmuls + bias add ---
    fused = (jnp.dot(wfh_ref[0, 0], h.astype(jnp.bfloat16),
                     preferred_element_type=jnp.float32)
             + jnp.dot(wfx_ref[0, 0], cross_sc[...].astype(jnp.bfloat16),
                       preferred_element_type=jnp.float32)
             + fb_ref[0, 0])
    fused = jnp.maximum(fused, 0.0)
    # positional encoding (dropout = identity in eval mode), then sigmoid
    pos = jax.nn.sigmoid(fused + pe_ref[...])

    # --- conv gates: roll-based im2col of [x; h] written into the patch scratch ---
    pad = (k - 1) // 2
    idx = 0
    for ky in range(k):
        dy = ky - pad
        for kx in range(k):
            dx = kx - pad
            off = dy * W + dx
            sx = x if off == 0 else pltpu.roll(x, (-off) % BN, 1)
            sh = h if off == 0 else pltpu.roll(h, (-off) % BN, 1)
            m = mask_ref[idx]                                # (1, B*N) 0/1 edge mask
            patch_sc[idx * ccp:idx * ccp + cinp, :] = sx * m
            patch_sc[idx * ccp + cinp:(idx + 1) * ccp, :] = sh * m
            idx += 1
    # bf16 MXU operands, f32 accumulation; bias added after the matmul
    gates = jnp.dot(wc_ref[0, 0], patch_sc[...].astype(jnp.bfloat16),
                    preferred_element_type=jnp.float32) + cb_ref[0, 0]

    i_g = jax.nn.sigmoid(gates[0 * hcp:1 * hcp])
    f_g = jax.nn.sigmoid(gates[1 * hcp:2 * hcp])
    o_g = jax.nn.sigmoid(gates[2 * hcp:3 * hcp])
    g_g = jnp.tanh(gates[3 * hcp:4 * hcp])

    c_next = f_g * c + pos
    h_next = o_g * jnp.tanh(c_next) + i_g * g_g + pos

    h_sc[...] = h_next
    c_sc[...] = c_next
    hseq_sc[t] = h_next                  # becomes layer l+1's input at this t

    # only the last layer's last-step hidden leaves the kernel
    @pl.when(jnp.logical_and(l == n_layers - 1, t == n_t - 1))
    def _():
        hout_ref[0] = h_next


# ---------------------------------------------------------------------------
# 1x1 output head: y = W_f @ h_fwd + W_r @ h_rev + b   (B folded into lanes)
# ---------------------------------------------------------------------------
def _head_kernel(h_ref, wf_ref, wr_ref, b_ref, o_ref):
    o_ref[...] = (
        jnp.dot(wf_ref[...], h_ref[0].astype(jnp.bfloat16),
                preferred_element_type=jnp.float32)
        + jnp.dot(wr_ref[...], h_ref[1].astype(jnp.bfloat16),
                  preferred_element_type=jnp.float32)
        + b_ref[...])


# ---------------------------------------------------------------------------
# Forward wrapper (plain-JAX glue: layout, padding, constant masks)
# ---------------------------------------------------------------------------
def lstmsa_forward(x1, x2, x3, packed, *, hidden_channels, kernel_size,
                   attention_size, num_classes):
    # TODO(synk): LSTMSA.encoder is an external module (None by default) -> identity here.
    B, C, H, W = x1.shape
    hc = hidden_channels[0]
    assert C == hc and all(h == hc for h in hidden_channels), \
        "attention bmm requires input_channels == hidden_channels"
    L = len(hidden_channels)
    T = 2
    N = H * W
    BN = B * N
    k = kernel_size
    hcp = _round_up(hc, 8)
    cinp = hcp
    ccp = cinp + hcp
    Kc = k * k * ccp
    ncp = _round_up(num_classes, 8)
    scale = 1.0 / math.sqrt(attention_size)

    # frame stacks: forward net sees (x1, x2), reverse net sees (x3, x2)
    x_nets = jnp.stack([jnp.stack([x1, x2], axis=1),
                        jnp.stack([x3, x2], axis=1)], axis=0)      # (2,B,T,C,H,W)
    x_nets = x_nets.reshape(2, B, T, C, N)
    x_nets = jnp.pad(x_nets, ((0, 0), (0, 0), (0, 0), (0, cinp - C), (0, 0)))
    x_nets = x_nets.transpose(0, 2, 3, 1, 4).reshape(2, T, cinp, BN)

    pe_bn = jnp.tile(packed["pe"], (1, B))                         # (hcp, B*N)

    # k*k edge-validity masks for the rolled im2col (constant over b/t/layer/net)
    ys, xs = jnp.divmod(jnp.arange(N, dtype=jnp.int32), W)
    pad = (k - 1) // 2
    rows = []
    for ky in range(k):
        dy = ky - pad
        for kx in range(k):
            dx = kx - pad
            rows.append(((xs + dx >= 0) & (xs + dx < W) &
                         (ys + dy >= 0) & (ys + dy < H)).astype(jnp.float32))
    mask = jnp.tile(jnp.stack(rows, axis=0)[:, None, :], (1, 1, B))  # (k*k,1,B*N)

    kern = functools.partial(_lstmsa_net_kernel, hcp=hcp, cinp=cinp, hc=hc,
                             batch=B, H=H, W=W, k=k, scale=scale, n_layers=L)
    grid_spec = pltpu.PrefetchScalarGridSpec(
        num_scalar_prefetch=0,
        grid=(2, L, T),
        in_specs=[
            pl.BlockSpec((1, 1, cinp, BN), lambda n, l, t: (n, t, 0, 0)),     # frames
            pl.BlockSpec((1, 1, 4 * hcp, Kc), lambda n, l, t: (n, l, 0, 0)),  # conv W
            pl.BlockSpec((1, 1, 4 * hcp, 1), lambda n, l, t: (n, l, 0, 0)),   # conv b
            pl.BlockSpec((1, 1, hcp, hcp), lambda n, l, t: (n, l, 0, 0)),     # fusion W_h
            pl.BlockSpec((1, 1, hcp, hcp), lambda n, l, t: (n, l, 0, 0)),     # fusion W_x
            pl.BlockSpec((1, 1, hcp, 1), lambda n, l, t: (n, l, 0, 0)),       # fusion b
            pl.BlockSpec((hcp, BN), lambda n, l, t: (0, 0)),                  # pos enc
            pl.BlockSpec((k * k, 1, BN), lambda n, l, t: (0, 0, 0)),          # edge masks
        ],
        out_specs=pl.BlockSpec((1, hcp, BN), lambda n, l, t: (n, 0, 0)),
        scratch_shapes=[
            pltpu.VMEM((hcp, BN), jnp.float32),        # h state
            pltpu.VMEM((hcp, BN), jnp.float32),        # c state
            pltpu.VMEM((T, hcp, BN), jnp.float32),     # inter-layer hidden sequence
            pltpu.VMEM((Kc, BN), jnp.float32),         # im2col patch scratch
            pltpu.VMEM((hcp, BN), jnp.float32),        # cross-attention output
        ],
    )
    h_fin = pl.pallas_call(
        kern,
        out_shape=jax.ShapeDtypeStruct((2, hcp, BN), jnp.float32),
        grid_spec=grid_spec,
        compiler_params=pltpu.CompilerParams(
            dimension_semantics=("parallel", "arbitrary", "arbitrary")),
    )(x_nets, packed["wc"], packed["cb"], packed["wfh"], packed["wfx"],
      packed["fb"], pe_bn, mask)

    y_p = pl.pallas_call(
        _head_kernel,
        out_shape=jax.ShapeDtypeStruct((ncp, BN), jnp.float32),
        grid_spec=pltpu.PrefetchScalarGridSpec(
            num_scalar_prefetch=0, grid=(1,),
            in_specs=[pl.BlockSpec((2, hcp, BN), lambda i: (0, 0, 0)),
                      pl.BlockSpec((ncp, hcp), lambda i: (0, 0)),
                      pl.BlockSpec((ncp, hcp), lambda i: (0, 0)),
                      pl.BlockSpec((ncp, 1), lambda i: (0, 0))],
            out_specs=pl.BlockSpec((ncp, BN), lambda i: (0, 0))),
    )(h_fin, packed["whf"], packed["whr"], packed["hb"])

    y = y_p.reshape(ncp, B, N).transpose(1, 0, 2)[:, :num_classes]
    return y.reshape(B, num_classes, H, W)


# ---------------------------------------------------------------------------
# Parameters
# ---------------------------------------------------------------------------
def _positional_encoding(d_model, seq_len):
    position = jnp.arange(seq_len, dtype=jnp.float32)[:, None]
    div_term = jnp.exp(jnp.arange(0, d_model, 2, dtype=jnp.float32)
                       * (-math.log(10000.0) / d_model))
    pe = jnp.zeros((seq_len, d_model), jnp.float32)
    pe = pe.at[:, 0::2].set(jnp.sin(position * div_term))
    pe = pe.at[:, 1::2].set(jnp.cos(position * div_term))
    return pe.T  # (d_model, seq_len) — matches pe[:, :N, :].permute(0, 2, 1)


def init_params(key, input_channels, hidden_channels, kernel_size, n_spatial, num_classes):
    """Raw (PyTorch-layout) parameters: two ConvLSTM stacks + 1x1 head."""
    k = kernel_size

    def init_net(net_key):
        layers = []
        in_chs = [input_channels] + list(hidden_channels)
        for l, hc in enumerate(hidden_channels):
            cin = in_chs[l]
            k1, k2, k3, k4 = jax.random.split(jax.random.fold_in(net_key, l), 4)
            layers.append(dict(
                conv_w=0.1 * jax.random.normal(k1, (4 * hc, cin + hc, k, k), jnp.float32),
                conv_b=0.1 * jax.random.normal(k2, (4 * hc,), jnp.float32),
                fusion_w=0.1 * jax.random.normal(k3, (hc, 2 * hc), jnp.float32),
                fusion_b=0.1 * jax.random.normal(k4, (hc,), jnp.float32),
                pe_t=_positional_encoding(hc, n_spatial)))
        return layers

    kf, kr, kh = jax.random.split(key, 3)
    head_w = 0.1 * jax.random.normal(jax.random.fold_in(kh, 0),
                                     (num_classes, 2 * hidden_channels[-1]), jnp.float32)
    head_b = 0.1 * jax.random.normal(jax.random.fold_in(kh, 1), (num_classes,), jnp.float32)
    return dict(forward_net=init_net(kf), reverse_net=init_net(kr),
                head_w=head_w, head_b=head_b)


def pack_params(raw, input_channels, hidden_channels, kernel_size, num_classes):
    """Pad to 8-sublane tiles, stack (net, layer) on leading axes, bf16 MXU weights."""
    hc = hidden_channels[0]
    assert input_channels == hc and all(h == hc for h in hidden_channels)
    k = kernel_size
    hcp = _round_up(hc, 8)
    cinp = hcp
    ccp = cinp + hcp
    Kc = k * k * ccp
    ncp = _round_up(num_classes, 8)

    def pack_net(layers):
        wcs, cbs, wfhs, wfxs, fbs = [], [], [], [], []
        for p in layers:
            w = p["conv_w"].reshape(4, hc, 2 * hc, k, k)   # (gate, oc, ic, ky, kx)
            wpad = jnp.zeros((4, hcp, k, k, ccp), jnp.float32)
            wpad = wpad.at[:, :hc, :, :, :hc].set(w[:, :, :hc].transpose(0, 1, 3, 4, 2))
            wpad = wpad.at[:, :hc, :, :, cinp:cinp + hc].set(
                w[:, :, hc:].transpose(0, 1, 3, 4, 2))
            wcs.append(wpad.reshape(4 * hcp, Kc))
            cb = jnp.zeros((4, hcp), jnp.float32).at[:, :hc].set(p["conv_b"].reshape(4, hc))
            cbs.append(cb.reshape(4 * hcp, 1))
            wfhs.append(jnp.zeros((hcp, hcp), jnp.float32).at[:hc, :hc].set(
                p["fusion_w"][:, :hc]))
            wfxs.append(jnp.zeros((hcp, hcp), jnp.float32).at[:hc, :hc].set(
                p["fusion_w"][:, hc:]))
            fbs.append(jnp.zeros((hcp, 1), jnp.float32).at[:hc, 0].set(p["fusion_b"]))
        return tuple(jnp.stack(a) for a in (wcs, cbs, wfhs, wfxs, fbs))

    f = pack_net(raw["forward_net"])
    r = pack_net(raw["reverse_net"])
    pe_t = raw["forward_net"][0]["pe_t"]           # identical for all cells (same d_model)
    pe = jnp.zeros((hcp, pe_t.shape[1]), jnp.float32).at[:hc, :].set(pe_t)
    whf = jnp.zeros((ncp, hcp), jnp.float32).at[:num_classes, :hc].set(raw["head_w"][:, :hc])
    whr = jnp.zeros((ncp, hcp), jnp.float32).at[:num_classes, :hc].set(raw["head_w"][:, hc:])
    hb = jnp.zeros((ncp, 1), jnp.float32).at[:num_classes, 0].set(raw["head_b"])
    return dict(
        wc=jnp.stack([f[0], r[0]]).astype(jnp.bfloat16),
        cb=jnp.stack([f[1], r[1]]),
        wfh=jnp.stack([f[2], r[2]]).astype(jnp.bfloat16),
        wfx=jnp.stack([f[3], r[3]]).astype(jnp.bfloat16),
        fb=jnp.stack([f[4], r[4]]),
        pe=pe,
        whf=whf.astype(jnp.bfloat16),
        whr=whr.astype(jnp.bfloat16),
        hb=hb)


# ---------------------------------------------------------------------------
# Pure-JAX f32 reference (mirrors the PyTorch module) for a correctness check
# ---------------------------------------------------------------------------
def _ref_cell(x_sp, h_sp, c_sp, p, hc, scale):
    B, C_in, H, W = x_sp.shape
    N = H * W
    q = x_sp.reshape(B, C_in, N)
    kk = h_sp.reshape(B, hc, N)
    energy = jnp.einsum("bcn,bhn->bch", q, kk, precision=lax.Precision.HIGHEST) * scale
    attn = jax.nn.softmax(energy, axis=2)
    cross = jnp.einsum("bch,bhn->bcn", attn, q, precision=lax.Precision.HIGHEST)
    cross_sp = cross.reshape(B, hc, H, W)
    fus_in = jnp.concatenate([h_sp, cross_sp], axis=1)
    fused = jnp.einsum("oj,bjhw->bohw", p["fusion_w"], fus_in,
                       precision=lax.Precision.HIGHEST) + p["fusion_b"][None, :, None, None]
    fused = jnp.maximum(fused, 0.0)
    pos = jax.nn.sigmoid(fused + p["pe_t"].reshape(1, hc, H, W))
    combined = jnp.concatenate([x_sp, h_sp], axis=1)
    conv = lax.conv_general_dilated(
        combined, p["conv_w"], window_strides=(1, 1), padding="SAME",
        dimension_numbers=("NCHW", "OIHW", "NCHW"),
        precision=lax.Precision.HIGHEST) + p["conv_b"][None, :, None, None]
    i_g, f_g, o_g, g_g = jnp.split(conv, 4, axis=1)
    i_g, f_g, o_g = jax.nn.sigmoid(i_g), jax.nn.sigmoid(f_g), jax.nn.sigmoid(o_g)
    g_g = jnp.tanh(g_g)
    c_next = f_g * c_sp + pos
    h_next = o_g * jnp.tanh(c_next) + i_g * g_g + pos
    return h_next, c_next


def _ref_convlstm(x_seq, layer_params, hidden_channels, attention_size):
    B, T, C_in, H, W = x_seq.shape
    scale = 1.0 / math.sqrt(attention_size)
    h = jnp.zeros((B, hidden_channels[0], H, W), jnp.float32)
    c = jnp.zeros((B, hidden_channels[0], H, W), jnp.float32)
    layer_in = x_seq
    for l, hc in enumerate(hidden_channels):
        outs = []
        for t in range(T):
            h, c = _ref_cell(layer_in[:, t], h, c, layer_params[l], hc, scale)
            outs.append(h)
        layer_in = jnp.stack(outs, axis=1)
    return layer_in[:, -1]


def _ref_lstmsa(x1, x2, x3, raw, *, hidden_channels, attention_size):
    xf = jnp.stack([x1, x2], axis=1)
    xr = jnp.stack([x3, x2], axis=1)
    yf = _ref_convlstm(xf, raw["forward_net"], hidden_channels, attention_size)
    yr = _ref_convlstm(xr, raw["reverse_net"], hidden_channels, attention_size)
    ycat = jnp.concatenate([yf, yr], axis=1)
    return (jnp.einsum("oc,bchw->bohw", raw["head_w"], ycat,
                       precision=lax.Precision.HIGHEST)
            + raw["head_b"][None, :, None, None])


# ---------------------------------------------------------------------------
if __name__ == "__main__":
    B, C_in, H, W = 2, 4, 16, 16
    hidden_channels = (4, 4)     # attention bmm requires hidden == input channels
    kernel_size = 3
    num_classes = 4
    attention_size = H * W       # attenion_size passed to the cells

    key = jax.random.PRNGKey(0)
    key, k1, k2, k3 = jax.random.split(key, 4)
    x1 = jax.random.normal(k1, (B, C_in, H, W), jnp.float32)
    x2 = jax.random.normal(k2, (B, C_in, H, W), jnp.float32)
    x3 = jax.random.normal(k3, (B, C_in, H, W), jnp.float32)

    raw = init_params(key, C_in, hidden_channels, kernel_size, H * W, num_classes)
    packed = pack_params(raw, C_in, hidden_channels, kernel_size, num_classes)

    fwd = jax.jit(functools.partial(
        lstmsa_forward, hidden_channels=hidden_channels, kernel_size=kernel_size,
        attention_size=attention_size, num_classes=num_classes))
    y = fwd(x1, x2, x3, packed)
    jax.block_until_ready(y)
    assert y.shape == (B, num_classes, H, W)
    assert bool(jnp.all(jnp.isfinite(y)))

    # correctness check against a pure-JAX f32 reference of the PyTorch module
    y_ref = jax.jit(functools.partial(
        _ref_lstmsa, hidden_channels=hidden_channels,
        attention_size=attention_size))(x1, x2, x3, raw)
    err = float(jnp.max(jnp.abs(y - y_ref)))
    # bf16 MXU operands (f32 accumulate) + approx-reciprocal softmax -> ~1e-2-scale error
    assert err < 3e-2, f"mismatch vs pure-JAX reference: max abs diff = {err}"
    print("KERNEL_OK")
</pallas_src>

<mosaic_0001>
module attributes {stable_mosaic.version = 11 : i64} {
  func.func @_head_kernel(%arg0: i32, %arg1: memref<2x8x512xf32, #tpu.memory_space<vmem>>, %arg2: memref<8x8xbf16, #tpu.memory_space<vmem>>, %arg3: memref<8x8xbf16, #tpu.memory_space<vmem>>, %arg4: memref<8x1xf32, #tpu.memory_space<vmem>>, %arg5: memref<8x512xf32, #tpu.memory_space<vmem>>) attributes {dimension_semantics = [#tpu.dimension_semantics<arbitrary>], iteration_bounds = array<i64: 1>, scalar_prefetch = 0 : i64, scratch_operands = 0 : i64, tpu.core_type = #tpu.core_type<tc>, window_params = [{pipeline_mode = #tpu.pipeline_mode<synchronous>, transform_indices = @transform_0, window_bounds = array<i64: 2, 8, 512>}, {pipeline_mode = #tpu.pipeline_mode<synchronous>, transform_indices = @transform_1, window_bounds = array<i64: 8, 8>}, {pipeline_mode = #tpu.pipeline_mode<synchronous>, transform_indices = @transform_2, window_bounds = array<i64: 8, 8>}, {pipeline_mode = #tpu.pipeline_mode<synchronous>, transform_indices = @transform_3, window_bounds = array<i64: 8, 1>}, {pipeline_mode = #tpu.pipeline_mode<synchronous>, transform_indices = @transform_4, window_bounds = array<i64: 8, 512>}]} {
    %c0 = arith.constant 0 : index
    %c0_0 = arith.constant 0 : index
    %0 = vector.load %arg2[%c0, %c0_0] : memref<8x8xbf16, #tpu.memory_space<vmem>>, vector<8x8xbf16>
    %c0_1 = arith.constant 0 : index
    %c0_2 = arith.constant 0 : index
    %c0_3 = arith.constant 0 : index
    %1 = vector.load %arg1[%c0_1, %c0_2, %c0_3] : memref<2x8x512xf32, #tpu.memory_space<vmem>>, vector<1x8x512xf32>
    %2 = vector.shape_cast %1 : vector<1x8x512xf32> to vector<8x512xf32>
    %3 = arith.truncf %2 : vector<8x512xf32> to vector<8x512xbf16>
    %cst = arith.constant dense<0.000000e+00> : vector<8x512xf32>
    %4 = tpu.matmul %0, %3, %cst {dimension_numbers = #tpu.dot_dimension_numbers<[1], [0], [0], [1], [0, 0, 1, 1], [], []>} : vector<8x8xbf16>, vector<8x512xbf16>, vector<8x512xf32> -> vector<8x512xf32>
    %c0_4 = arith.constant 0 : index
    %c0_5 = arith.constant 0 : index
    %5 = vector.load %arg3[%c0_4, %c0_5] : memref<8x8xbf16, #tpu.memory_space<vmem>>, vector<8x8xbf16>
    %c1 = arith.constant 1 : index
    %c0_6 = arith.constant 0 : index
    %c0_7 = arith.constant 0 : index
    %6 = vector.load %arg1[%c1, %c0_6, %c0_7] : memref<2x8x512xf32, #tpu.memory_space<vmem>>, vector<1x8x512xf32>
    %7 = vector.shape_cast %6 : vector<1x8x512xf32> to vector<8x512xf32>
    %8 = arith.truncf %7 : vector<8x512xf32> to vector<8x512xbf16>
    %cst_8 = arith.constant dense<0.000000e+00> : vector<8x512xf32>
    %9 = tpu.matmul %5, %8, %cst_8 {dimension_numbers = #tpu.dot_dimension_numbers<[1], [0], [0], [1], [0, 0, 1, 1], [], []>} : vector<8x8xbf16>, vector<8x512xbf16>, vector<8x512xf32> -> vector<8x512xf32>
    %10 = arith.addf %4, %9 : vector<8x512xf32>
    %c0_9 = arith.constant 0 : index
    %c0_10 = arith.constant 0 : index
    %11 = vector.load %arg4[%c0_9, %c0_10] : memref<8x1xf32, #tpu.memory_space<vmem>>, vector<8x1xf32>
    %12 = vector.broadcast %11 : vector<8x1xf32> to vector<8x512xf32>
    %13 = arith.addf %10, %12 : vector<8x512xf32>
    %c0_11 = arith.constant 0 : index
    %c0_12 = arith.constant 0 : index
    %14 = vector.load %arg5[%c0_11, %c0_12] : memref<8x512xf32, #tpu.memory_space<vmem>>, vector<8x512xf32>
    tpu.vector_store %arg5[%c0_11, %c0_12], %13 {strides = array<i32>} : memref<8x512xf32, #tpu.memory_space<vmem>>, vector<8x512xf32>,
    return
  }
  func.func @transform_0(%arg0: i32) -> (i32, i32, i32) {
    %c0_i32 = arith.constant 0 : i32
    %c0_i32_0 = arith.constant 0 : i32
    %c0_i32_1 = arith.constant 0 : i32
    %c0_i32_2 = arith.constant 0 : i32
    return %c0_i32, %c0_i32_0, %c0_i32_1 : i32, i32, i32
  }
  func.func @transform_1(%arg0: i32) -> (i32, i32) {
    %c0_i32 = arith.constant 0 : i32
    %c0_i32_0 = arith.constant 0 : i32
    %c0_i32_1 = arith.constant 0 : i32
    return %c0_i32, %c0_i32_0 : i32, i32
  }
  func.func @transform_2(%arg0: i32) -> (i32, i32) {
    %c0_i32 = arith.constant 0 : i32
    %c0_i32_0 = arith.constant 0 : i32
    %c0_i32_1 = arith.constant 0 : i32
    return %c0_i32, %c0_i32_0 : i32, i32
  }
  func.func @transform_3(%arg0: i32) -> (i32, i32) {
    %c0_i32 = arith.constant 0 : i32
    %c0_i32_0 = arith.constant 0 : i32
    %c0_i32_1 = arith.constant 0 : i32
    return %c0_i32, %c0_i32_0 : i32, i32
  }
  func.func @transform_4(%arg0: i32) -> (i32, i32) {
    %c0_i32 = arith.constant 0 : i32
    %c0_i32_0 = arith.constant 0 : i32
    %c0_i32_1 = arith.constant 0 : i32
    return %c0_i32, %c0_i32_0 : i32, i32
  }
}

module attributes {stable_mosaic.version = 11 : i64} {
  func.func @_lstmsa_net_kernel(%arg0: i32, %arg1: i32, %arg2: i32, %arg3: memref<1x1x8x512xf32, #tpu.memory_space<vmem>>, %arg4: memref<1x1x32x144xbf16, #tpu.memory_space<vmem>>, %arg5: memref<1x1x32x1xf32, #tpu.memory_space<vmem>>, %arg6: memref<1x1x8x8xbf16, #tpu.memory_space<vmem>>, %arg7: memref<1x1x8x8xbf16, #tpu.memory_space<vmem>>, %arg8: memref<1x1x8x1xf32, #tpu.memory_space<vmem>>, %arg9: memref<8x512xf32, #tpu.memory_space<vmem>>, %arg10: memref<9x1x512xf32, #tpu.memory_space<vmem>>, %arg11: memref<1x8x512xf32, #tpu.memory_space<vmem>>, %arg12: memref<8x512xf32, #tpu.memory_space<vmem>>, %arg13: memref<8x512xf32, #tpu.memory_space<vmem>>, %arg14: memref<2x8x512xf32, #tpu.memory_space<vmem>>, %arg15: memref<144x512xf32, #tpu.memory_space<vmem>>, %arg16: memref<8x512xf32, #tpu.memory_space<vmem>>) attributes {dimension_semantics = [#tpu.dimension_semantics<parallel>, #tpu.dimension_semantics<arbitrary>, #tpu.dimension_semantics<arbitrary>], iteration_bounds = array<i64: 2, 2, 2>, scalar_prefetch = 0 : i64, scratch_operands = 5 : i64, tpu.core_type = #tpu.core_type<tc>, window_params = [{transform_indices = @transform_0, window_bounds = array<i64: 1, 1, 8, 512>}, {transform_indices = @transform_1, window_bounds = array<i64: 1, 1, 32, 144>}, {transform_indices = @transform_2, window_bounds = array<i64: 1, 1, 32, 1>}, {transform_indices = @transform_3, window_bounds = array<i64: 1, 1, 8, 8>}, {transform_indices = @transform_4, window_bounds = array<i64: 1, 1, 8, 8>}, {transform_indices = @transform_5, window_bounds = array<i64: 1, 1, 8, 1>}, {pipeline_mode = #tpu.pipeline_mode<synchronous>, transform_indices = @transform_6, window_bounds = array<i64: 8, 512>}, {pipeline_mode = #tpu.pipeline_mode<synchronous>, transform_indices = @transform_7, window_bounds = array<i64: 9, 1, 512>}, {transform_indices = @transform_8, window_bounds = array<i64: 1, 8, 512>}]} {
    %c0_i32 = arith.constant 0 : i32
    %0 = arith.cmpi eq, %arg1, %c0_i32 : i32
    %c0_i32_0 = arith.constant 0 : i32
    %1 = arith.cmpi eq, %arg2, %c0_i32_0 : i32
    %2 = arith.andi %0, %1 : i1
    %3 = arith.extui %2 : i1 to i32
    %c0_i32_1 = arith.constant 0 : i32
    %4 = arith.cmpi ne, %3, %c0_i32_1 : i32
    scf.if %4 {
      %cst_113 = arith.constant 0.000000e+00 : f32
      %213 = vector.broadcast %cst_113 : f32 to vector<8x512xf32>
      %c0_114 = arith.constant 0 : index
      %c0_115 = arith.constant 0 : index
      %214 = vector.load %arg12[%c0_114, %c0_115] : memref<8x512xf32, #tpu.memory_space<vmem>>, vector<8x512xf32>
      tpu.vector_store %arg12[%c0_114, %c0_115], %213 {strides = array<i32>} : memref<8x512xf32, #tpu.memory_space<vmem>>, vector<8x512xf32>,
      %cst_116 = arith.constant 0.000000e+00 : f32
      %215 = vector.broadcast %cst_116 : f32 to vector<8x512xf32>
      %c0_117 = arith.constant 0 : index
      %c0_118 = arith.constant 0 : index
      %216 = vector.load %arg13[%c0_117, %c0_118] : memref<8x512xf32, #tpu.memory_space<vmem>>, vector<8x512xf32>
      tpu.vector_store %arg13[%c0_117, %c0_118], %215 {strides = array<i32>} : memref<8x512xf32, #tpu.memory_space<vmem>>, vector<8x512xf32>,
    } else {
    }
    %c0_i32_2 = arith.constant 0 : i32
    %5 = arith.cmpi eq, %arg1, %c0_i32_2 : i32
    %6 = arith.extui %5 : i1 to i32
    %c0_i32_3 = arith.constant 0 : i32
    %7 = arith.cmpi ne, %6, %c0_i32_3 : i32
    scf.if %7 {
      %c0_113 = arith.constant 0 : index
      %c0_114 = arith.constant 0 : index
      %c0_115 = arith.constant 0 : index
      %c0_116 = arith.constant 0 : index
      %213 = vector.load %arg3[%c0_113, %c0_114, %c0_115, %c0_116] : memref<1x1x8x512xf32, #tpu.memory_space<vmem>>, vector<1x1x8x512xf32>
      %214 = vector.shape_cast %213 : vector<1x1x8x512xf32> to vector<8x512xf32>
      %215 = arith.index_cast %arg2 : i32 to index
      %c0_117 = arith.constant 0 : index
      %c0_118 = arith.constant 0 : index
      %216 = vector.load %arg14[%215, %c0_117, %c0_118] : memref<2x8x512xf32, #tpu.memory_space<vmem>>, vector<1x8x512xf32>
      %217 = vector.shape_cast %216 : vector<1x8x512xf32> to vector<8x512xf32>
      %218 = vector.shape_cast %214 : vector<8x512xf32> to vector<1x8x512xf32>
      tpu.vector_store %arg14[%215, %c0_117, %c0_118], %218 {strides = array<i32>} : memref<2x8x512xf32, #tpu.memory_space<vmem>>, vector<1x8x512xf32>,
    } else {
    }
    %8 = arith.index_cast %arg2 : i32 to index
    %c0 = arith.constant 0 : index
    %c0_4 = arith.constant 0 : index
    %9 = vector.load %arg14[%8, %c0, %c0_4] : memref<2x8x512xf32, #tpu.memory_space<vmem>>, vector<1x8x512xf32>
    %10 = vector.shape_cast %9 : vector<1x8x512xf32> to vector<8x512xf32>
    %c0_5 = arith.constant 0 : index
    %c0_6 = arith.constant 0 : index
    %11 = vector.load %arg12[%c0_5, %c0_6] : memref<8x512xf32, #tpu.memory_space<vmem>>, vector<8x512xf32>
    %c0_7 = arith.constant 0 : index
    %c0_8 = arith.constant 0 : index
    %12 = vector.load %arg13[%c0_7, %c0_8] : memref<8x512xf32, #tpu.memory_space<vmem>>, vector<8x512xf32>
    %13 = tpu.iota {dimensions = array<i32: 1>} : vector<8x8xi32>
    %c4_i32 = arith.constant 4 : i32
    %14 = vector.broadcast %c4_i32 : i32 to vector<8x8xi32>
    %15 = arith.cmpi slt, %13, %14 : vector<8x8xi32>
    %cst = arith.constant 0.000000e+00 : f32
    %cst_9 = arith.constant -1.000000e+30 : f32
    %16 = vector.broadcast %cst : f32 to vector<8x8xf32>
    %17 = vector.broadcast %cst_9 : f32 to vector<8x8xf32>
    %18 = arith.select %15, %16, %17 : vector<8x8xi1>, vector<8x8xf32>
    %19 = vector.extract_strided_slice %10 {offsets = [0, 0], sizes = [8, 256], strides = [1, 1]} : vector<8x512xf32> to vector<8x256xf32>
    %20 = vector.extract_strided_slice %11 {offsets = [0, 0], sizes = [8, 256], strides = [1, 1]} : vector<8x512xf32> to vector<8x256xf32>
    %cst_10 = arith.constant dense<0.000000e+00> : vector<8x8xf32>
    %21 = tpu.matmul %19, %20, %cst_10 {dimension_numbers = #tpu.dot_dimension_numbers<[1], [1], [0], [0], [0, 0, 1, 0], [], []>} : vector<8x256xf32>, vector<8x256xf32>, vector<8x8xf32> -> vector<8x8xf32>
    %cst_11 = arith.constant 6.250000e-02 : f32
    %22 = vector.broadcast %cst_11 : f32 to vector<8x8xf32>
    %23 = arith.mulf %21, %22 : vector<8x8xf32>
    %24 = arith.addf %23, %18 : vector<8x8xf32>
    %cst_12 = arith.constant dense<0xFF800000> : vector<8xf32>
    %25 = vector.multi_reduction <maximumf>, %24, %cst_12 [1] : vector<8x8xf32> to vector<8xf32>
    %26 = vector.shape_cast %25 : vector<8xf32> to vector<8x1xf32>
    %27 = vector.broadcast %26 : vector<8x1xf32> to vector<8x8xf32>
    %28 = arith.subf %24, %27 : vector<8x8xf32>
    %29 = math.exp %28 : vector<8x8xf32>
    %cst_13 = arith.constant dense<0.000000e+00> : vector<8xf32>
    %30 = vector.multi_reduction <add>, %29, %cst_13 [1] : vector<8x8xf32> to vector<8xf32>
    %31 = vector.shape_cast %30 : vector<8xf32> to vector<8x1xf32>
    %32 = tpu.reciprocal %31 {approx = true} : vector<8x1xf32> -> vector<8x1xf32>
    %33 = vector.broadcast %32 : vector<8x1xf32> to vector<8x8xf32>
    %34 = arith.mulf %29, %33 : vector<8x8xf32>
    %cst_14 = arith.constant dense<0.000000e+00> : vector<8x256xf32>
    %35 = tpu.matmul %34, %19, %cst_14 {dimension_numbers = #tpu.dot_dimension_numbers<[1], [0], [0], [1], [0, 0, 1, 1], [], []>} : vector<8x8xf32>, vector<8x256xf32>, vector<8x256xf32> -> vector<8x256xf32>
    %c0_15 = arith.constant 0 : index
    %c0_16 = arith.constant 0 : index
    %36 = vector.load %arg16[%c0_15, %c0_16] : memref<8x512xf32, #tpu.memory_space<vmem>>, vector<8x256xf32>
    tpu.vector_store %arg16[%c0_15, %c0_16], %35 {strides = array<i32>} : memref<8x512xf32, #tpu.memory_space<vmem>>, vector<8x256xf32>,
    %37 = vector.extract_strided_slice %10 {offsets = [0, 256], sizes = [8, 256], strides = [1, 1]} : vector<8x512xf32> to vector<8x256xf32>
    %38 = vector.extract_strided_slice %11 {offsets = [0, 256], sizes = [8, 256], strides = [1, 1]} : vector<8x512xf32> to vector<8x256xf32>
    %cst_17 = arith.constant dense<0.000000e+00> : vector<8x8xf32>
    %39 = tpu.matmul %37, %38, %cst_17 {dimension_numbers = #tpu.dot_dimension_numbers<[1], [1], [0], [0], [0, 0, 1, 0], [], []>} : vector<8x256xf32>, vector<8x256xf32>, vector<8x8xf32> -> vector<8x8xf32>
    %cst_18 = arith.constant 6.250000e-02 : f32
    %40 = vector.broadcast %cst_18 : f32 to vector<8x8xf32>
    %41 = arith.mulf %39, %40 : vector<8x8xf32>
    %42 = arith.addf %41, %18 : vector<8x8xf32>
    %cst_19 = arith.constant dense<0xFF800000> : vector<8xf32>
    %43 = vector.multi_reduction <maximumf>, %42, %cst_19 [1] : vector<8x8xf32> to vector<8xf32>
    %44 = vector.shape_cast %43 : vector<8xf32> to vector<8x1xf32>
    %45 = vector.broadcast %44 : vector<8x1xf32> to vector<8x8xf32>
    %46 = arith.subf %42, %45 : vector<8x8xf32>
    %47 = math.exp %46 : vector<8x8xf32>
    %cst_20 = arith.constant dense<0.000000e+00> : vector<8xf32>
    %48 = vector.multi_reduction <add>, %47, %cst_20 [1] : vector<8x8xf32> to vector<8xf32>
    %49 = vector.shape_cast %48 : vector<8xf32> to vector<8x1xf32>
    %50 = tpu.reciprocal %49 {approx = true} : vector<8x1xf32> -> vector<8x1xf32>
    %51 = vector.broadcast %50 : vector<8x1xf32> to vector<8x8xf32>
    %52 = arith.mulf %47, %51 : vector<8x8xf32>
    %cst_21 = arith.constant dense<0.000000e+00> : vector<8x256xf32>
    %53 = tpu.matmul %52, %37, %cst_21 {dimension_numbers = #tpu.dot_dimension_numbers<[1], [0], [0], [1], [0, 0, 1, 1], [], []>} : vector<8x8xf32>, vector<8x256xf32>, vector<8x256xf32> -> vector<8x256xf32>
    %c0_22 = arith.constant 0 : index
    %c256 = arith.constant 256 : index
    %54 = vector.load %arg16[%c0_22, %c256] : memref<8x512xf32, #tpu.memory_space<vmem>>, vector<8x256xf32>
    tpu.vector_store %arg16[%c0_22, %c256], %53 {strides = array<i32>} : memref<8x512xf32, #tpu.memory_space<vmem>>, vector<8x256xf32>,
    %c0_23 = arith.constant 0 : index
    %c0_24 = arith.constant 0 : index
    %c0_25 = arith.constant 0 : index
    %c0_26 = arith.constant 0 : index
    %55 = vector.load %arg6[%c0_23, %c0_24, %c0_25, %c0_26] : memref<1x1x8x8xbf16, #tpu.memory_space<vmem>>, vector<1x1x8x8xbf16>
    %56 = vector.shape_cast %55 : vector<1x1x8x8xbf16> to vector<8x8xbf16>
    %57 = arith.truncf %11 : vector<8x512xf32> to vector<8x512xbf16>
    %cst_27 = arith.constant dense<0.000000e+00> : vector<8x512xf32>
    %58 = tpu.matmul %56, %57, %cst_27 {dimension_numbers = #tpu.dot_dimension_numbers<[1], [0], [0], [1], [0, 0, 1, 1], [], []>} : vector<8x8xbf16>, vector<8x512xbf16>, vector<8x512xf32> -> vector<8x512xf32>
    %c0_28 = arith.constant 0 : index
    %c0_29 = arith.constant 0 : index
    %c0_30 = arith.constant 0 : index
    %c0_31 = arith.constant 0 : index
    %59 = vector.load %arg7[%c0_28, %c0_29, %c0_30, %c0_31] : memref<1x1x8x8xbf16, #tpu.memory_space<vmem>>, vector<1x1x8x8xbf16>
    %60 = vector.shape_cast %59 : vector<1x1x8x8xbf16> to vector<8x8xbf16>
    %c0_32 = arith.constant 0 : index
    %c0_33 = arith.constant 0 : index
    %61 = vector.load %arg16[%c0_32, %c0_33] : memref<8x512xf32, #tpu.memory_space<vmem>>, vector<8x512xf32>
    %62 = arith.truncf %61 : vector<8x512xf32> to vector<8x512xbf16>
    %cst_34 = arith.constant dense<0.000000e+00> : vector<8x512xf32>
    %63 = tpu.matmul %60, %62, %cst_34 {dimension_numbers = #tpu.dot_dimension_numbers<[1], [0], [0], [1], [0, 0, 1, 1], [], []>} : vector<8x8xbf16>, vector<8x512xbf16>, vector<8x512xf32> -> vector<8x512xf32>
    %64 = arith.addf %58, %63 : vector<8x512xf32>
    %c0_35 = arith.constant 0 : index
    %c0_36 = arith.constant 0 : index
    %c0_37 = arith.constant 0 : index
    %c0_38 = arith.constant 0 : index
    %65 = vector.load %arg8[%c0_35, %c0_36, %c0_37, %c0_38] : memref<1x1x8x1xf32, #tpu.memory_space<vmem>>, vector<1x1x8x1xf32>
    %66 = vector.shape_cast %65 : vector<1x1x8x1xf32> to vector<8x1xf32>
    %67 = vector.broadcast %66 : vector<8x1xf32> to vector<8x512xf32>
    %68 = arith.addf %64, %67 : vector<8x512xf32>
    %cst_39 = arith.constant 0.000000e+00 : f32
    %69 = vector.broadcast %cst_39 : f32 to vector<8x512xf32>
    %70 = arith.maximumf %68, %69 : vector<8x512xf32>
    %c0_40 = arith.constant 0 : index
    %c0_41 = arith.constant 0 : index
    %71 = vector.load %arg9[%c0_40, %c0_41] : memref<8x512xf32, #tpu.memory_space<vmem>>, vector<8x512xf32>
    %72 = arith.addf %70, %71 : vector<8x512xf32>
    %73 = arith.negf %72 : vector<8x512xf32>
    %74 = math.exp %73 : vector<8x512xf32>
    %cst_42 = arith.constant 1.000000e+00 : f32
    %75 = vector.broadcast %cst_42 : f32 to vector<8x512xf32>
    %76 = arith.addf %75, %74 : vector<8x512xf32>
    %77 = arith.divf %75, %76 : vector<8x512xf32>
    %c17_i32 = arith.constant 17 : i32
    %78 = tpu.dynamic_rotate %10 by %c17_i32 dim 1 : vector<8x512xf32>, i32 -> vector<8x512xf32>
    %c17_i32_43 = arith.constant 17 : i32
    %79 = tpu.dynamic_rotate %11 by %c17_i32_43 dim 1 : vector<8x512xf32>, i32 -> vector<8x512xf32>
    %c0_44 = arith.constant 0 : index
    %c0_45 = arith.constant 0 : index
    %c0_46 = arith.constant 0 : index
    %80 = vector.load %arg10[%c0_44, %c0_45, %c0_46] : memref<9x1x512xf32, #tpu.memory_space<vmem>>, vector<1x1x512xf32>
    %81 = vector.shape_cast %80 : vector<1x1x512xf32> to vector<1x512xf32>
    %82 = vector.broadcast %81 : vector<1x512xf32> to vector<8x512xf32>
    %83 = arith.mulf %78, %82 : vector<8x512xf32>
    %c0_47 = arith.constant 0 : index
    %c0_48 = arith.constant 0 : index
    %84 = vector.load %arg15[%c0_47, %c0_48] : memref<144x512xf32, #tpu.memory_space<vmem>>, vector<8x512xf32>
    tpu.vector_store %arg15[%c0_47, %c0_48], %83 {strides = array<i32>} : memref<144x512xf32, #tpu.memory_space<vmem>>, vector<8x512xf32>,
    %85 = vector.broadcast %81 : vector<1x512xf32> to vector<8x512xf32>
    %86 = arith.mulf %79, %85 : vector<8x512xf32>
    %c8 = arith.constant 8 : index
    %c0_49 = arith.constant 0 : index
    %87 = vector.load %arg15[%c8, %c0_49] : memref<144x512xf32, #tpu.memory_space<vmem>>, vector<8x512xf32>
    tpu.vector_store %arg15[%c8, %c0_49], %86 {strides = array<i32>} : memref<144x512xf32, #tpu.memory_space<vmem>>, vector<8x512xf32>,
    %c16_i32 = arith.constant 16 : i32
    %88 = tpu.dynamic_rotate %10 by %c16_i32 dim 1 : vector<8x512xf32>, i32 -> vector<8x512xf32>
    %c16_i32_50 = arith.constant 16 : i32
    %89 = tpu.dynamic_rotate %11 by %c16_i32_50 dim 1 : vector<8x512xf32>, i32 -> vector<8x512xf32>
    %c1 = arith.constant 1 : index
    %c0_51 = arith.constant 0 : index
    %c0_52 = arith.constant 0 : index
    %90 = vector.load %arg10[%c1, %c0_51, %c0_52] : memref<9x1x512xf32, #tpu.memory_space<vmem>>, vector<1x1x512xf32>
    %91 = vector.shape_cast %90 : vector<1x1x512xf32> to vector<1x512xf32>
    %92 = vector.broadcast %91 : vector<1x512xf32> to vector<8x512xf32>
    %93 = arith.mulf %88, %92 : vector<8x512xf32>
    %c16 = arith.constant 16 : index
    %c0_53 = arith.constant 0 : index
    %94 = vector.load %arg15[%c16, %c0_53] : memref<144x512xf32, #tpu.memory_space<vmem>>, vector<8x512xf32>
    tpu.vector_store %arg15[%c16, %c0_53], %93 {strides = array<i32>} : memref<144x512xf32, #tpu.memory_space<vmem>>, vector<8x512xf32>,
    %95 = vector.broadcast %91 : vector<1x512xf32> to vector<8x512xf32>
    %96 = arith.mulf %89, %95 : vector<8x512xf32>
    %c24 = arith.constant 24 : index
    %c0_54 = arith.constant 0 : index
    %97 = vector.load %arg15[%c24, %c0_54] : memref<144x512xf32, #tpu.memory_space<vmem>>, vector<8x512xf32>
    tpu.vector_store %arg15[%c24, %c0_54], %96 {strides = array<i32>} : memref<144x512xf32, #tpu.memory_space<vmem>>, vector<8x512xf32>,
    %c15_i32 = arith.constant 15 : i32
    %98 = tpu.dynamic_rotate %10 by %c15_i32 dim 1 : vector<8x512xf32>, i32 -> vector<8x512xf32>
    %c15_i32_55 = arith.constant 15 : i32
    %99 = tpu.dynamic_rotate %11 by %c15_i32_55 dim 1 : vector<8x512xf32>, i32 -> vector<8x512xf32>
    %c2 = arith.constant 2 : index
    %c0_56 = arith.constant 0 : index
    %c0_57 = arith.constant 0 : index
    %100 = vector.load %arg10[%c2, %c0_56, %c0_57] : memref<9x1x512xf32, #tpu.memory_space<vmem>>, vector<1x1x512xf32>
    %101 = vector.shape_cast %100 : vector<1x1x512xf32> to vector<1x512xf32>
    %102 = vector.broadcast %101 : vector<1x512xf32> to vector<8x512xf32>
    %103 = arith.mulf %98, %102 : vector<8x512xf32>
    %c32 = arith.constant 32 : index
    %c0_58 = arith.constant 0 : index
    %104 = vector.load %arg15[%c32, %c0_58] : memref<144x512xf32, #tpu.memory_space<vmem>>, vector<8x512xf32>
    tpu.vector_store %arg15[%c32, %c0_58], %103 {strides = array<i32>} : memref<144x512xf32, #tpu.memory_space<vmem>>, vector<8x512xf32>,
    %105 = vector.broadcast %101 : vector<1x512xf32> to vector<8x512xf32>
    %106 = arith.mulf %99, %105 : vector<8x512xf32>
    %c40 = arith.constant 40 : index
    %c0_59 = arith.constant 0 : index
    %107 = vector.load %arg15[%c40, %c0_59] : memref<144x512xf32, #tpu.memory_space<vmem>>, vector<8x512xf32>
    tpu.vector_store %arg15[%c40, %c0_59], %106 {strides = array<i32>} : memref<144x512xf32, #tpu.memory_space<vmem>>, vector<8x512xf32>,
    %c1_i32 = arith.constant 1 : i32
    %108 = tpu.dynamic_rotate %10 by %c1_i32 dim 1 : vector<8x512xf32>, i32 -> vector<8x512xf32>
    %c1_i32_60 = arith.constant 1 : i32
    %109 = tpu.dynamic_rotate %11 by %c1_i32_60 dim 1 : vector<8x512xf32>, i32 -> vector<8x512xf32>
    %c3 = arith.constant 3 : index
    %c0_61 = arith.constant 0 : index
    %c0_62 = arith.constant 0 : index
    %110 = vector.load %arg10[%c3, %c0_61, %c0_62] : memref<9x1x512xf32, #tpu.memory_space<vmem>>, vector<1x1x512xf32>
    %111 = vector.shape_cast %110 : vector<1x1x512xf32> to vector<1x512xf32>
    %112 = vector.broadcast %111 : vector<1x512xf32> to vector<8x512xf32>
    %113 = arith.mulf %108, %112 : vector<8x512xf32>
    %c48 = arith.constant 48 : index
    %c0_63 = arith.constant 0 : index
    %114 = vector.load %arg15[%c48, %c0_63] : memref<144x512xf32, #tpu.memory_space<vmem>>, vector<8x512xf32>
    tpu.vector_store %arg15[%c48, %c0_63], %113 {strides = array<i32>} : memref<144x512xf32, #tpu.memory_space<vmem>>, vector<8x512xf32>,
    %115 = vector.broadcast %111 : vector<1x512xf32> to vector<8x512xf32>
    %116 = arith.mulf %109, %115 : vector<8x512xf32>
    %c56 = arith.constant 56 : index
    %c0_64 = arith.constant 0 : index
    %117 = vector.load %arg15[%c56, %c0_64] : memref<144x512xf32, #tpu.memory_space<vmem>>, vector<8x512xf32>
    tpu.vector_store %arg15[%c56, %c0_64], %116 {strides = array<i32>} : memref<144x512xf32, #tpu.memory_space<vmem>>, vector<8x512xf32>,
    %c4 = arith.constant 4 : index
    %c0_65 = arith.constant 0 : index
    %c0_66 = arith.constant 0 : index
    %118 = vector.load %arg10[%c4, %c0_65, %c0_66] : memref<9x1x512xf32, #tpu.memory_space<vmem>>, vector<1x1x512xf32>
    %119 = vector.shape_cast %118 : vector<1x1x512xf32> to vector<1x512xf32>
    %120 = vector.broadcast %119 : vector<1x512xf32> to vector<8x512xf32>
    %121 = arith.mulf %10, %120 : vector<8x512xf32>
    %c64 = arith.constant 64 : index
    %c0_67 = arith.constant 0 : index
    %122 = vector.load %arg15[%c64, %c0_67] : memref<144x512xf32, #tpu.memory_space<vmem>>, vector<8x512xf32>
    tpu.vector_store %arg15[%c64, %c0_67], %121 {strides = array<i32>} : memref<144x512xf32, #tpu.memory_space<vmem>>, vector<8x512xf32>,
    %123 = vector.broadcast %119 : vector<1x512xf32> to vector<8x512xf32>
    %124 = arith.mulf %11, %123 : vector<8x512xf32>
    %c72 = arith.constant 72 : index
    %c0_68 = arith.constant 0 : index
    %125 = vector.load %arg15[%c72, %c0_68] : memref<144x512xf32, #tpu.memory_space<vmem>>, vector<8x512xf32>
    tpu.vector_store %arg15[%c72, %c0_68], %124 {strides = array<i32>} : memref<144x512xf32, #tpu.memory_space<vmem>>, vector<8x512xf32>,
    %c511_i32 = arith.constant 511 : i32
    %126 = tpu.dynamic_rotate %10 by %c511_i32 dim 1 : vector<8x512xf32>, i32 -> vector<8x512xf32>
    %c511_i32_69 = arith.constant 511 : i32
    %127 = tpu.dynamic_rotate %11 by %c511_i32_69 dim 1 : vector<8x512xf32>, i32 -> vector<8x512xf32>
    %c5 = arith.constant 5 : index
    %c0_70 = arith.constant 0 : index
    %c0_71 = arith.constant 0 : index
    %128 = vector.load %arg10[%c5, %c0_70, %c0_71] : memref<9x1x512xf32, #tpu.memory_space<vmem>>, vector<1x1x512xf32>
    %129 = vector.shape_cast %128 : vector<1x1x512xf32> to vector<1x512xf32>
    %130 = vector.broadcast %129 : vector<1x512xf32> to vector<8x512xf32>
    %131 = arith.mulf %126, %130 : vector<8x512xf32>
    %c80 = arith.constant 80 : index
    %c0_72 = arith.constant 0 : index
    %132 = vector.load %arg15[%c80, %c0_72] : memref<144x512xf32, #tpu.memory_space<vmem>>, vector<8x512xf32>
    tpu.vector_store %arg15[%c80, %c0_72], %131 {strides = array<i32>} : memref<144x512xf32, #tpu.memory_space<vmem>>, vector<8x512xf32>,
    %133 = vector.broadcast %129 : vector<1x512xf32> to vector<8x512xf32>
    %134 = arith.mulf %127, %133 : vector<8x512xf32>
    %c88 = arith.constant 88 : index
    %c0_73 = arith.constant 0 : index
    %135 = vector.load %arg15[%c88, %c0_73] : memref<144x512xf32, #tpu.memory_space<vmem>>, vector<8x512xf32>
    tpu.vector_store %arg15[%c88, %c0_73], %134 {strides = array<i32>} : memref<144x512xf32, #tpu.memory_space<vmem>>, vector<8x512xf32>,
    %c497_i32 = arith.constant 497 : i32
    %136 = tpu.dynamic_rotate %10 by %c497_i32 dim 1 : vector<8x512xf32>, i32 -> vector<8x512xf32>
    %c497_i32_74 = arith.constant 497 : i32
    %137 = tpu.dynamic_rotate %11 by %c497_i32_74 dim 1 : vector<8x512xf32>, i32 -> vector<8x512xf32>
    %c6 = arith.constant 6 : index
    %c0_75 = arith.constant 0 : index
    %c0_76 = arith.constant 0 : index
    %138 = vector.load %arg10[%c6, %c0_75, %c0_76] : memref<9x1x512xf32, #tpu.memory_space<vmem>>, vector<1x1x512xf32>
    %139 = vector.shape_cast %138 : vector<1x1x512xf32> to vector<1x512xf32>
    %140 = vector.broadcast %139 : vector<1x512xf32> to vector<8x512xf32>
    %141 = arith.mulf %136, %140 : vector<8x512xf32>
    %c96 = arith.constant 96 : index
    %c0_77 = arith.constant 0 : index
    %142 = vector.load %arg15[%c96, %c0_77] : memref<144x512xf32, #tpu.memory_space<vmem>>, vector<8x512xf32>
    tpu.vector_store %arg15[%c96, %c0_77], %141 {strides = array<i32>} : memref<144x512xf32, #tpu.memory_space<vmem>>, vector<8x512xf32>,
    %143 = vector.broadcast %139 : vector<1x512xf32> to vector<8x512xf32>
    %144 = arith.mulf %137, %143 : vector<8x512xf32>
    %c104 = arith.constant 104 : index
    %c0_78 = arith.constant 0 : index
    %145 = vector.load %arg15[%c104, %c0_78] : memref<144x512xf32, #tpu.memory_space<vmem>>, vector<8x512xf32>
    tpu.vector_store %arg15[%c104, %c0_78], %144 {strides = array<i32>} : memref<144x512xf32, #tpu.memory_space<vmem>>, vector<8x512xf32>,
    %c496_i32 = arith.constant 496 : i32
    %146 = tpu.dynamic_rotate %10 by %c496_i32 dim 1 : vector<8x512xf32>, i32 -> vector<8x512xf32>
    %c496_i32_79 = arith.constant 496 : i32
    %147 = tpu.dynamic_rotate %11 by %c496_i32_79 dim 1 : vector<8x512xf32>, i32 -> vector<8x512xf32>
    %c7 = arith.constant 7 : index
    %c0_80 = arith.constant 0 : index
    %c0_81 = arith.constant 0 : index
    %148 = vector.load %arg10[%c7, %c0_80, %c0_81] : memref<9x1x512xf32, #tpu.memory_space<vmem>>, vector<1x1x512xf32>
    %149 = vector.shape_cast %148 : vector<1x1x512xf32> to vector<1x512xf32>
    %150 = vector.broadcast %149 : vector<1x512xf32> to vector<8x512xf32>
    %151 = arith.mulf %146, %150 : vector<8x512xf32>
    %c112 = arith.constant 112 : index
    %c0_82 = arith.constant 0 : index
    %152 = vector.load %arg15[%c112, %c0_82] : memref<144x512xf32, #tpu.memory_space<vmem>>, vector<8x512xf32>
    tpu.vector_store %arg15[%c112, %c0_82], %151 {strides = array<i32>} : memref<144x512xf32, #tpu.memory_space<vmem>>, vector<8x512xf32>,
    %153 = vector.broadcast %149 : vector<1x512xf32> to vector<8x512xf32>
    %154 = arith.mulf %147, %153 : vector<8x512xf32>
    %c120 = arith.constant 120 : index
    %c0_83 = arith.constant 0 : index
    %155 = vector.load %arg15[%c120, %c0_83] : memref<144x512xf32, #tpu.memory_space<vmem>>, vector<8x512xf32>
    tpu.vector_store %arg15[%c120, %c0_83], %154 {strides = array<i32>} : memref<144x512xf32, #tpu.memory_space<vmem>>, vector<8x512xf32>,
    %c495_i32 = arith.constant 495 : i32
    %156 = tpu.dynamic_rotate %10 by %c495_i32 dim 1 : vector<8x512xf32>, i32 -> vector<8x512xf32>
    %c495_i32_84 = arith.constant 495 : i32
    %157 = tpu.dynamic_rotate %11 by %c495_i32_84 dim 1 : vector<8x512xf32>, i32 -> vector<8x512xf32>
    %c8_85 = arith.constant 8 : index
    %c0_86 = arith.constant 0 : index
    %c0_87 = arith.constant 0 : index
    %158 = vector.load %arg10[%c8_85, %c0_86, %c0_87] : memref<9x1x512xf32, #tpu.memory_space<vmem>>, vector<1x1x512xf32>
    %159 = vector.shape_cast %158 : vector<1x1x512xf32> to vector<1x512xf32>
    %160 = vector.broadcast %159 : vector<1x512xf32> to vector<8x512xf32>
    %161 = arith.mulf %156, %160 : vector<8x512xf32>
    %c128 = arith.constant 128 : index
    %c0_88 = arith.constant 0 : index
    %162 = vector.load %arg15[%c128, %c0_88] : memref<144x512xf32, #tpu.memory_space<vmem>>, vector<8x512xf32>
    tpu.vector_store %arg15[%c128, %c0_88], %161 {strides = array<i32>} : memref<144x512xf32, #tpu.memory_space<vmem>>, vector<8x512xf32>,
    %163 = vector.broadcast %159 : vector<1x512xf32> to vector<8x512xf32>
    %164 = arith.mulf %157, %163 : vector<8x512xf32>
    %c136 = arith.constant 136 : index
    %c0_89 = arith.constant 0 : index
    %165 = vector.load %arg15[%c136, %c0_89] : memref<144x512xf32, #tpu.memory_space<vmem>>, vector<8x512xf32>
    tpu.vector_store %arg15[%c136, %c0_89], %164 {strides = array<i32>} : memref<144x512xf32, #tpu.memory_space<vmem>>, vector<8x512xf32>,
    %c0_90 = arith.constant 0 : index
    %c0_91 = arith.constant 0 : index
    %c0_92 = arith.constant 0 : index
    %c0_93 = arith.constant 0 : index
    %166 = vector.load %arg4[%c0_90, %c0_91, %c0_92, %c0_93] : memref<1x1x32x144xbf16, #tpu.memory_space<vmem>>, vector<1x1x32x144xbf16>
    %167 = vector.shape_cast %166 : vector<1x1x32x144xbf16> to vector<32x144xbf16>
    %c0_94 = arith.constant 0 : index
    %c0_95 = arith.constant 0 : index
    %168 = vector.load %arg15[%c0_94, %c0_95] : memref<144x512xf32, #tpu.memory_space<vmem>>, vector<144x512xf32>
    %169 = arith.truncf %168 : vector<144x512xf32> to vector<144x512xbf16>
    %cst_96 = arith.constant dense<0.000000e+00> : vector<32x512xf32>
    %170 = tpu.matmul %167, %169, %cst_96 {dimension_numbers = #tpu.dot_dimension_numbers<[1], [0], [0], [1], [0, 0, 1, 1], [], []>} : vector<32x144xbf16>, vector<144x512xbf16>, vector<32x512xf32> -> vector<32x512xf32>
    %c0_97 = arith.constant 0 : index
    %c0_98 = arith.constant 0 : index
    %c0_99 = arith.constant 0 : index
    %c0_100 = arith.constant 0 : index
    %171 = vector.load %arg5[%c0_97, %c0_98, %c0_99, %c0_100] : memref<1x1x32x1xf32, #tpu.memory_space<vmem>>, vector<1x1x32x1xf32>
    %172 = vector.shape_cast %171 : vector<1x1x32x1xf32> to vector<32x1xf32>
    %173 = vector.broadcast %172 : vector<32x1xf32> to vector<32x512xf32>
    %174 = arith.addf %170, %173 : vector<32x512xf32>
    %175 = vector.extract_strided_slice %174 {offsets = [0, 0], sizes = [8, 512], strides = [1, 1]} : vector<32x512xf32> to vector<8x512xf32>
    %176 = arith.negf %175 : vector<8x512xf32>
    %177 = math.exp %176 : vector<8x512xf32>
    %cst_101 = arith.constant 1.000000e+00 : f32
    %178 = vector.broadcast %cst_101 : f32 to vector<8x512xf32>
    %179 = arith.addf %178, %177 : vector<8x512xf32>
    %180 = arith.divf %178, %179 : vector<8x512xf32>
    %181 = vector.extract_strided_slice %174 {offsets = [8, 0], sizes = [8, 512], strides = [1, 1]} : vector<32x512xf32> to vector<8x512xf32>
    %182 = arith.negf %181 : vector<8x512xf32>
    %183 = math.exp %182 : vector<8x512xf32>
    %cst_102 = arith.constant 1.000000e+00 : f32
    %184 = vector.broadcast %cst_102 : f32 to vector<8x512xf32>
    %185 = arith.addf %184, %183 : vector<8x512xf32>
    %186 = arith.divf %184, %185 : vector<8x512xf32>
    %187 = vector.extract_strided_slice %174 {offsets = [16, 0], sizes = [8, 512], strides = [1, 1]} : vector<32x512xf32> to vector<8x512xf32>
    %188 = arith.negf %187 : vector<8x512xf32>
    %189 = math.exp %188 : vector<8x512xf32>
    %cst_103 = arith.constant 1.000000e+00 : f32
    %190 = vector.broadcast %cst_103 : f32 to vector<8x512xf32>
    %191 = arith.addf %190, %189 : vector<8x512xf32>
    %192 = arith.divf %190, %191 : vector<8x512xf32>
    %193 = vector.extract_strided_slice %174 {offsets = [24, 0], sizes = [8, 512], strides = [1, 1]} : vector<32x512xf32> to vector<8x512xf32>
    %194 = math.tanh %193 : vector<8x512xf32>
    %195 = arith.mulf %186, %12 : vector<8x512xf32>
    %196 = arith.addf %195, %77 : vector<8x512xf32>
    %197 = math.tanh %196 : vector<8x512xf32>
    %198 = arith.mulf %192, %197 : vector<8x512xf32>
    %199 = arith.mulf %180, %194 : vector<8x512xf32>
    %200 = arith.addf %198, %199 : vector<8x512xf32>
    %201 = arith.addf %200, %77 : vector<8x512xf32>
    %c0_104 = arith.constant 0 : index
    %c0_105 = arith.constant 0 : index
    %202 = vector.load %arg12[%c0_104, %c0_105] : memref<8x512xf32, #tpu.memory_space<vmem>>, vector<8x512xf32>
    tpu.vector_store %arg12[%c0_104, %c0_105], %201 {strides = array<i32>} : memref<8x512xf32, #tpu.memory_space<vmem>>, vector<8x512xf32>,
    %c0_106 = arith.constant 0 : index
    %c0_107 = arith.constant 0 : index
    %203 = vector.load %arg13[%c0_106, %c0_107] : memref<8x512xf32, #tpu.memory_space<vmem>>, vector<8x512xf32>
    tpu.vector_store %arg13[%c0_106, %c0_107], %196 {strides = array<i32>} : memref<8x512xf32, #tpu.memory_space<vmem>>, vector<8x512xf32>,
    %204 = arith.index_cast %arg2 : i32 to index
    %c0_108 = arith.constant 0 : index
    %c0_109 = arith.constant 0 : index
    %205 = vector.load %arg14[%204, %c0_108, %c0_109] : memref<2x8x512xf32, #tpu.memory_space<vmem>>, vector<1x8x512xf32>
    %206 = vector.shape_cast %205 : vector<1x8x512xf32> to vector<8x512xf32>
    %207 = vector.shape_cast %201 : vector<8x512xf32> to vector<1x8x512xf32>
    tpu.vector_store %arg14[%204, %c0_108, %c0_109], %207 {strides = array<i32>} : memref<2x8x512xf32, #tpu.memory_space<vmem>>, vector<1x8x512xf32>,
    %c1_i32_110 = arith.constant 1 : i32
    %208 = arith.cmpi eq, %arg1, %c1_i32_110 : i32
    %c1_i32_111 = arith.constant 1 : i32
    %209 = arith.cmpi eq, %arg2, %c1_i32_111 : i32
    %210 = arith.andi %208, %209 : i1
    %211 = arith.extui %210 : i1 to i32
    %c0_i32_112 = arith.constant 0 : i32
    %212 = arith.cmpi ne, %211, %c0_i32_112 : i32
    scf.if %212 {
      %c0_113 = arith.constant 0 : index
      %c0_114 = arith.constant 0 : index
      %c0_115 = arith.constant 0 : index
      %213 = vector.load %arg11[%c0_113, %c0_114, %c0_115] : memref<1x8x512xf32, #tpu.memory_space<vmem>>, vector<1x8x512xf32>
      %214 = vector.shape_cast %213 : vector<1x8x512xf32> to vector<8x512xf32>
      %215 = vector.shape_cast %201 : vector<8x512xf32> to vector<1x8x512xf32>
      tpu.vector_store %arg11[%c0_113, %c0_114, %c0_115], %215 {strides = array<i32>} : memref<1x8x512xf32, #tpu.memory_space<vmem>>, vector<1x8x512xf32>,
    } else {
    }
    return
  }
  func.func @transform_0(%arg0: i32, %arg1: i32, %arg2: i32) -> (i32, i32, i32, i32) {
    %c0_i32 = arith.constant 0 : i32
    %c0_i32_0 = arith.constant 0 : i32
    %c0_i32_1 = arith.constant 0 : i32
    return %arg0, %arg2, %c0_i32, %c0_i32_0 : i32, i32, i32, i32
  }
  func.func @transform_1(%arg0: i32, %arg1: i32, %arg2: i32) -> (i32, i32, i32, i32) {
    %c0_i32 = arith.constant 0 : i32
    %c0_i32_0 = arith.constant 0 : i32
    %c0_i32_1 = arith.constant 0 : i32
    return %arg0, %arg1, %c0_i32, %c0_i32_0 : i32, i32, i32, i32
  }
  func.func @transform_2(%arg0: i32, %arg1: i32, %arg2: i32) -> (i32, i32, i32, i32) {
    %c0_i32 = arith.constant 0 : i32
    %c0_i32_0 = arith.constant 0 : i32
    %c0_i32_1 = arith.constant 0 : i32
    return %arg0, %arg1, %c0_i32, %c0_i32_0 : i32, i32, i32, i32
  }
  func.func @transform_3(%arg0: i32, %arg1: i32, %arg2: i32) -> (i32, i32, i32, i32) {
    %c0_i32 = arith.constant 0 : i32
    %c0_i32_0 = arith.constant 0 : i32
    %c0_i32_1 = arith.constant 0 : i32
    return %arg0, %arg1, %c0_i32, %c0_i32_0 : i32, i32, i32, i32
  }
  func.func @transform_4(%arg0: i32, %arg1: i32, %arg2: i32) -> (i32, i32, i32, i32) {
    %c0_i32 = arith.constant 0 : i32
    %c0_i32_0 = arith.constant 0 : i32
    %c0_i32_1 = arith.constant 0 : i32
    return %arg0, %arg1, %c0_i32, %c0_i32_0 : i32, i32, i32, i32
  }
  func.func @transform_5(%arg0: i32, %arg1: i32, %arg2: i32) -> (i32, i32, i32, i32) {
    %c0_i32 = arith.constant 0 : i32
    %c0_i32_0 = arith.constant 0 : i32
    %c0_i32_1 = arith.constant 0 : i32
    return %arg0, %arg1, %c0_i32, %c0_i32_0 : i32, i32, i32, i32
  }
  func.func @transform_6(%arg0: i32, %arg1: i32, %arg2: i32) -> (i32, i32) {
    %c0_i32 = arith.constant 0 : i32
    %c0_i32_0 = arith.constant 0 : i32
    %c0_i32_1 = arith.constant 0 : i32
    return %c0_i32, %c0_i32_0 : i32, i32
  }
  func.func @transform_7(%arg0: i32, %arg1: i32, %arg2: i32) -> (i32, i32, i32) {
    %c0_i32 = arith.constant 0 : i32
    %c0_i32_0 = arith.constant 0 : i32
    %c0_i32_1 = arith.constant 0 : i32
    %c0_i32_2 = arith.constant 0 : i32
    return %c0_i32, %c0_i32_0, %c0_i32_1 : i32, i32, i32
  }
  func.func @transform_8(%arg0: i32, %arg1: i32, %arg2: i32) -> (i32, i32, i32) {
    %c0_i32 = arith.constant 0 : i32
    %c0_i32_0 = arith.constant 0 : i32
    %c0_i32_1 = arith.constant 0 : i32
    return %arg0, %c0_i32, %c0_i32_0 : i32, i32, i32
  }
}

</mosaic_0001>

<bundles_post_ra>
// kernel: lstmsa_forward.3
= control target key start
LH: loop header
LB: loop body
LE: loop exit
PB: predicated region body
PF: predicated region fallthrough
CT: control target
= control target key end

     0   :  { %vm41_vm0 = vcmask 1043456   ;;  %v205_v3 = vmov 0   ;;  %vm37_vm1 = vcmask 64512   ;;  %s292_s0 = inlined_call_operand.vmem [shape: f32[2,8,512], index: 0, kind: input, shape index: {}]   ;;  %s293_s2 = inlined_call_operand.vmem [shape: bf16[8,8], index: 2, kind: input, shape index: {}]   ;;  %s294_s3 = inlined_call_operand.vmem [shape: f32[8,1], index: 3, kind: input, shape index: {}]   ;;  %s295_s1 = inlined_call_operand.vmem [shape: bf16[8,8], index: 1, kind: input, shape index: {}]   ;;  %s296_s4 = inlined_call_operand.vmem [shape: f32[8,512], index: 4, kind: output, shape index: {}]  }
   0x1   :  { %v191_v0 = vld [vmem:[%s292_s0 + $0x20] sm:$0xff]  ;;  %v192_v1 = vld [vmem:[%s292_s0 + $0x28] sm:$0xff]  ;;  %v193_v2 = vld [vmem:[%s292_s0 + $0x30] sm:$0xff]  ;;  %204 = vset.pattern.permute.xlu0 %v205_v3 }
   0x2   :  { %v33_v4 = vpack.c.bf16 %v191_v0, %v191_v0  ;;  %v34_v5 = vpack.c.bf16 %v192_v1, %v192_v1  ;;  %v35_v6 = vpack.c.bf16 %v193_v2, %v193_v2  ;;  %v194_v7 = vld [vmem:[%s292_s0 + $0x38] sm:$0xff]  ;;  %v21_v8 = vld [vmem:[%s292_s0 + $0x10] sm:$0xff]  ;;  %v19_v12 = vld [vmem:[%s292_s0] sm:$0xff] }
   0x3   :  { %v36_v9 = vpack.c.bf16 %v194_v7, %v194_v7  ;;  %v25_v10 = vpack.c.bf16 %v21_v8, %v21_v8  ;;  %v22_v11 = vld [vmem:[%s292_s0 + $0x18] sm:$0xff]  ;;  %v20_v13 = vld [vmem:[%s292_s0 + $0x8] sm:$0xff]  ;;  %v27_v19 = vld [vmem:[%s293_s2] sm:$0xf]  ;;  %v23_v21 = vpack.c.bf16 %v19_v12, %v19_v12 }
   0x4   :  { %v43_v14 = vsel %vm41_vm0, %v33_v4, 0  ;;  %v46_v15 = vsel %vm41_vm0, %v34_v5, 0  ;;  %v49_v16 = vsel %vm41_vm0, %v35_v6, 0  ;;  %v26_v17 = vpack.c.bf16 %v22_v11, %v22_v11  ;;  %v173_v26 = vld [vmem:[%s294_s3] sm:$0xff] }
   0x5   :  { %61 = vmatpush.bf16.msra.mxu0 %v43_v14  ;;  %74 = vmatpush.bf16.msra.mxu1 %v46_v15  ;;  %v52_v18 = vsel %vm41_vm0, %v36_v9, 0  ;;  %v116_v20 = vsel %vm41_vm0, %v25_v10, 0  ;;  %v24_v22 = vpack.c.bf16 %v20_v13, %v20_v13  ;;  %v110_v24 = vsel %vm41_vm0, %v23_v21, 0  ;;  %v18_v27 = vld [vmem:[%s295_s1] sm:$0xf] }
   0x6   :  { %87 = vmatpush.bf16.msra.mxu2 %v49_v16  ;;  %100 = vmatpush.bf16.msra.mxu3 %v52_v18  ;;  %v119_v23 = vsel %vm41_vm0, %v26_v17, 0 }
   0x7   :  { %v113_v25 = vsel %vm41_vm0, %v24_v22, 0  ;;  %176 = vperm.xlu0 %204, %v173_v26  }
   0x8   :  { %195 = vmatmul.msk.bf16.vlgmr.msra.gmra.mxu0 %vm37_vm1, %v27_v19  ;;  %196 = vmatmul.msk.bf16.vlgmr.msra.gmra.mxu1 %vm37_vm1, %v27_v19 }
   0x9   :  { %197 = vmatmul.msk.bf16.vlgmr.msra.gmra.mxu2 %vm37_vm1, %v27_v19  ;;  %198 = vmatmul.msk.bf16.vlgmr.msra.gmra.mxu3 %vm37_vm1, %v27_v19 }
   0xa   :  { %154 = vmatpush.bf16.msrb.mxu2 %v116_v20  ;;  %167 = vmatpush.bf16.msrb.mxu3 %v119_v23 }
   0xb   :  { %128 = vmatpush.bf16.msrb.mxu0 %v110_v24  ;;  %141 = vmatpush.bf16.msrb.mxu1 %v113_v25 }
  0x18   :  { %199 = vmatmul.msk.bf16.vlgmr.msrb.gmra.mxu0 %vm37_vm1, %v18_v27  ;;  %200 = vmatmul.msk.bf16.vlgmr.msrb.gmra.mxu1 %vm37_vm1, %v18_v27 }
  0x19   :  { %201 = vmatmul.msk.bf16.vlgmr.msrb.gmra.mxu2 %vm37_vm1, %v18_v27  ;;  %202 = vmatmul.msk.bf16.vlgmr.msrb.gmra.mxu3 %vm37_vm1, %v18_v27 }
  0x79   :  { %v177_v34 = vpop.permute.xlu0 %176 }
  0x85   :  { %v63_v28 = vpop.f32.mrf.mxu0  ;;  %v76_v29 = vpop.f32.mrf.mxu1 }
  0x8c   :  { %v89_v30 = vpop.f32.mrf.mxu2  ;;  %v102_v31 = vpop.f32.mrf.mxu3 }
  0x8d   :  { %v65_v32 = vpop.f32.mrf.mxu0  ;;  %v78_v33 = vpop.f32.mrf.mxu1 }
  0x94   :  { %v91_v35 = vpop.f32.mrf.mxu2  ;;  %v104_v36 = vpop.f32.mrf.mxu3 }
  0x95   :  { %v130_v37 = vpop.f32.mrf.mxu0  ;;  %v143_v38 = vpop.f32.mrf.mxu1 }
  0x96   :  { %v131_v39 = vadd.f32 %v130_v37, %v63_v28  ;;  %v144_v40 = vadd.f32 %v143_v38, %v76_v29 }
  0x98   :  { %v179_v41 = vadd.f32 %v177_v34, %v131_v39  ;;  %v180_v42 = vadd.f32 %v177_v34, %v144_v40 }
  0x9a   :  { %183 = vst [vmem:[%s296_s4] sm:$0xff] %v179_v41 }
  0x9b   :  { %184 = vst [vmem:[%s296_s4 + $0x8] sm:$0xff] %v180_v42 }
  0x9c   :  { %v156_v43 = vpop.f32.mrf.mxu2  ;;  %v169_v44 = vpop.f32.mrf.mxu3 }
  0x9d   :  { %v157_v45 = vadd.f32 %v156_v43, %v89_v30  ;;  %v170_v46 = vadd.f32 %v169_v44, %v102_v31  ;;  %v132_v47 = vpop.f32.mrf.mxu0  ;;  %v145_v48 = vpop.f32.mrf.mxu1 }
  0x9f   :  { %v181_v49 = vadd.f32 %v177_v34, %v157_v45  ;;  %v182_v50 = vadd.f32 %v177_v34, %v170_v46 }
  0xa1   :  { %185 = vst [vmem:[%s296_s4 + $0x10] sm:$0xff] %v181_v49 }
  0xa2   :  { %186 = vst [vmem:[%s296_s4 + $0x18] sm:$0xff] %v182_v50 }
  0xa4   :  { %v158_v51 = vpop.f32.mrf.mxu2  ;;  %v171_v52 = vpop.f32.mrf.mxu3 }

// kernel: lstmsa_forward.2
= control target key start
LH: loop header
LB: loop body
LE: loop exit
PB: predicated region body
PF: predicated region fallthrough
CT: control target
= control target key end

     0   :  { %s2576_s27 = smov 0   ;;  %s2578_s28 = smov 0   ;;  %s3807_s0 = inlined_call_operand.vmem [shape: f32[2,2,8,512], index: 0, kind: input, shape index: {}]   ;;  %s3808_s1 = inlined_call_operand.vmem [shape: bf16[2,2,32,144], index: 1, kind: input, shape index: {}]   ;;  %s3809_s2 = inlined_call_operand.vmem [shape: f32[2,2,32,1], index: 2, kind: input, shape index: {}]   ;;  %s3810_s3 = inlined_call_operand.vmem [shape: bf16[2,2,8,8], index: 3, kind: input, shape index: {}]   ;;  %s3811_s4 = inlined_call_operand.vmem [shape: bf16[2,2,8,8], index: 4, kind: input, shape index: {}]   ;;  %s3812_s5 = inlined_call_operand.vmem [shape: f32[2,2,8,1], index: 5, kind: input, shape index: {}]   ;;  %s3813_s6 = inlined_call_operand.vmem [shape: f32[8,512], index: 6, kind: input, shape index: {}]   ;;  %s3814_s7 = inlined_call_operand.vmem [shape: f32[9,1,512], index: 7, kind: input, shape index: {}]   ;;  %s3815_s8 = inlined_call_operand.vmem [shape: f32[2,8,512], index: 8, kind: output, shape index: {}]  }
   0x1   :  { %3849 = sst [smem:[#allocation38_spill]] %s3807_s0  ;;  %s2580_s29 = smov 0  }
   0x2   :  { %3850 = sst [smem:[#allocation39_spill]] %s3813_s6  ;;  %s2582_s30 = smov 0  }
   0x3   :  { %3851 = sst [smem:[#allocation40_spill]] %s3815_s8  ;;  %s2584_s9 = smov 0  }
   0x4   :  { %s2586_s10 = smov 0   ;;  %s2588_s11 = smov 0  }
   0x5 LB: > { %3852 = sst [smem:[#allocation7_spill]] %s2506_s30  ;;  %s30_s12 = sadd.s32 1, %s2506_s30  ;;  %s2518_s11 = sphi %s2588_s11, %s18_s11   ;;  %s2514_s10 = sphi %s2586_s10, %s3956_s10   ;;  %s2510_s9 = sphi %s2584_s9, %s3955_s9   ;;  %s2506_s30 = sphi %s2582_s30, %s3954_s30   ;;  %s2502_s29 = sphi %s2580_s29, %s3953_s29   ;;  %s2498_s28 = sphi %s2578_s28, %s3952_s28   ;;  %s2494_s27 = sphi %s2576_s27, %s3951_s27  }
   0x6   : > { %3853 = sst [smem:[#allocation8_spill]] %s2510_s9  ;;  %p31_p0 = scmp.ge.s32.totalorder %s30_s12, 2 }
   0x7   : > { %3854 = sst [smem:[#allocation9_spill]] %s2514_s10  ;;  %s33_s13 = sadd.s32 1, %s2510_s9 }
   0x8   : > { %3855 = sst [smem:[#allocation10_spill]] %s2518_s11  ;;  %p2214_p1 = scmp.ge.s32.totalorder %s2518_s11, 1 }
   0x9   : > { %p364_p2 = scmp.lt.s32.totalorder %s2518_s11, 9  ;;  %s3958_s12 = smov (%p31_p0, %s30_s12), 0 }
   0xa   : > { %3856 = sst [smem:[#allocation11_spill]] %s3958_s12  ;;  %s3960_s13 = smov (!%p31_p0, %s33_s13), %s2510_s9 }
   0xb   : > { %p365_p3 = pnand %p2214_p1, %p364_p2  ;;  %p35_p4 = scmp.ge.s32.totalorder %s3960_s13, 2 }
   0xc   : > { %s37_s14 = sadd.s32 1, %s2514_s10 }
   0xd   : > { %s3962_s13 = smov (%p35_p4, %s3960_s13), 0  ;;  %s3964_s14 = smov (!%p35_p4, %s37_s14), %s2514_s10 }
   0xe   : > { %3857 = sst [smem:[#allocation12_spill]] %s3962_s13  ;;  %p39_p5 = scmp.ge.s32.totalorder %s3964_s14, 2 }
   0xf   : > { %368 = sbr.rel (%p365_p3) target bundleno = 1253 (0x4e5), region = 52 }
  0x10   : > { %s3966_s14 = smov (%p39_p5, %s3964_s14), 0 }
  0x11   : > { %3858 = sst [smem:[#allocation13_spill]] %s3966_s14 }
  0x14   : > { %p444_p6 = scmp.lt.s32.totalorder %s2502_s29, 1  ;;  %p446_p7 = scmp.lt.s32.totalorder %s2494_s27, 1 }
  0x15   : > { %p455_p8 = scmp.lt.s32.totalorder %s2498_s28, 1  ;;  %p501_p9 = scmp.eq.s32.totalorder %s2498_s28, 0 }
  0x16   : > { %s3968_s29 = smov (!%p444_p6, %s2502_s29), 1  ;;  %s3859_s8 = sld [smem:[#allocation40_spill]] }
  0x17   : > { %s447_s15 = scalar_select %p446_p7, %s2494_s27, 1 }
  0x18   : > { %s2216_s16 = sshll.u32 %s3968_s29, 3  ;;  %s2219_s18 = sshll.u32 %s3968_s29, 4 }
  0x19   : > { %s2215_s17 = sshll.u32 %s447_s15, 2  ;;  %s2299_s20 = sshll.u32 %s3968_s29, 5 }
  0x1a   : > { %s450_s19 = sadd.s32 %s2216_s16, %s2215_s17  ;;  %s3861_s0 = sld [smem:[#allocation38_spill]] }
  0x1b   : > { %s2217_s21 = sshll.u32 %s450_s19, 3  ;;  %p502_p10 = scmp.eq.s32.totalorder %s2494_s27, 0 }
  0x1c   : > { %s2629_s24 = scalar_lea.vmem %s3859_s8, %s2299_s20  ;;  %s2224_s12 = sshll.u32 %s3968_s29, 1 }
  0x1d   : > { %3860 = sst [smem:[#allocation14_spill]] %s2629_s24  ;;  %p2638_p11 = pnand %p502_p10, %p501_p9 }
  0x1e   : > { %s456_s13 = scalar_select %p455_p8, %s2498_s28, 1 }
  0x20   : > { %s2634_s14 = scalar_lea.vmem %s3861_s0, %s2217_s21  ;;  %s2218_s15 = sshll.u32 %s456_s13, 3 }
  0x21   : > { %s2221_s17 = sshll.u32 %s456_s13, 2  ;;  %s459_s19 = sadd.s32 %s2219_s18, %s2218_s15 }
  0x22   : > { %s468_s9 = sadd.s32 %s2221_s17, %s2216_s16  ;;  %s2220_s30 = sshll.u32 %s459_s19, 2 }
  0x23   : > { %s2223_s22 = sshll.u32 %s468_s9, 3  ;;  %s2645_s8 = scalar_lea.vmem %s3808_s1, %s2220_s30 }
  0x24   : > { %s2650_s26 = scalar_lea.vmem %s3809_s2, %s2223_s22  ;;  %s476_s29 = sadd.s32 %s2224_s12, %s456_s13 }
  0x25   : > { %s2225_s0 = sshll.u32 %s476_s29, 2  ;;  %s2229_s11 = sshll.u32 %s476_s29, 3 }
  0x26   : > { %s2655_s18 = scalar_lea.vmem %s3810_s3, %s2225_s0  ;;  %s2660_s15 = scalar_lea.vmem %s3811_s4, %s2225_s0 }
  0x27   : > { %s2665_s19 = scalar_lea.vmem %s3812_s5, %s2229_s11  ;;  %506 = sbr.rel (%p2638_p11) target bundleno = 53 (0x35), region = 56 }
  0x2c   : > { %v2520_v0 = vmov 0.0  }
  0x2d   : > { %507 = vst [vmem:[#allocation2 + $0x10] sm:$0xff] %v2520_v0 }
  0x2e   : > { %508 = vst [vmem:[#allocation2] sm:$0xff] %v2520_v0 }
  0x2f   : > { %509 = vst [vmem:[#allocation2 + $0x18] sm:$0xff] %v2520_v0 }
  0x30   : > { %510 = vst [vmem:[#allocation2 + $0x8] sm:$0xff] %v2520_v0 }
  0x31   : > { %511 = vst [vmem:[#allocation3] sm:$0xff] %v2520_v0 }
  0x32   : > { %512 = vst [vmem:[#allocation3 + $0x18] sm:$0xff] %v2520_v0 }
  0x33   : > { %513 = vst [vmem:[#allocation3 + $0x8] sm:$0xff] %v2520_v0 }
  0x34   : > { %514 = vst [vmem:[#allocation3 + $0x10] sm:$0xff] %v2520_v0 }
  0x35 PF: > { %p2232_p12 = scmp.ne.s32.totalorder %s2498_s28, 0 }
  0x36   : > { %s2300_s0 = sshll.u32 (!%p2232_p12), %s2494_s27, 5 }
  0x37   : > { %517 = sbr.rel (%p2232_p12) target bundleno = 65 (0x41), region = 60  ;;  %s524_s6 = scalar_lea.vmem (!%p2232_p12), [#allocation4], %s2300_s0 }
  0x3c   : > { %v518_v1 = vld [vmem:[%s2634_s14] sm:$0xff]  ;;  %v519_v2 = vld [vmem:[%s2634_s14 + $0x8] sm:$0xff]  ;;  %v520_v3 = vld [vmem:[%s2634_s14 + $0x10] sm:$0xff] }
  0x3d   : > { %525 = vst [vmem:[%s524_s6] sm:$0xff] %v518_v1  ;;  %v521_v4 = vld [vmem:[%s2634_s14 + $0x18] sm:$0xff] }
  0x3e   : > { %526 = vst [vmem:[%s524_s6 + $0x8] sm:$0xff] %v519_v2 }
  0x3f   : > { %527 = vst [vmem:[%s524_s6 + $0x10] sm:$0xff] %v520_v3 }
  0x40   : > { %528 = vst [vmem:[%s524_s6 + $0x18] sm:$0xff] %v521_v4 }
  0x41 PF: > { %v2675_v5 = vld [vmem:[#allocation2 + $0x10] sm:$0xff]  ;;  %s2301_s10 = sshll.u32 %s2494_s27, 5  ;;  %v2678_v6 = vld [vmem:[#allocation2] sm:$0xff]  ;;  %v544_v9 = vlaneseq  ;;  %v2521_v14 = vmov -1e+30   ;;  %vm590_vm1 = vcmask 64512  }
  0x42   : > { %563 = vmatpush.xpose.msra.mxu3 %v2675_v5  ;;  %583 = vmatpush.xpose.msra.mxu1 %v2678_v6  ;;  %s2682_s11 = scalar_lea.vmem [#allocation4], %s2301_s10  ;;  %v2702_v24 = vld [vmem:[#allocation2 + $0x18] sm:$0xff]  ;;  %v2704_v25 = vld [vmem:[#allocation2 + $0x8] sm:$0xff]  ;;  %s2522_s12 = smov 112   ;;  %vm762_vm2 = vcmask 1043456   ;;  %v746_v2 = vpack.c.bf16 %v2675_v5, %v2675_v5  ;;  %vm1588_vm11 = vcmask 130048  }
  0x43   : > { %v2694_v10 = vand.u32 127, %v544_v9  ;;  %662 = vmatpush.xpose.msra.mxu2 %v2702_v24  ;;  %s2523_s13 = smov 113   ;;  %s2524_s14 = smov 127   ;;  %v2877_v9 = vld [vmem:[%s2660_s15] sm:$0xf] }
  0x44   : > { %s2525_s24 = smov 1   ;;  %s2526_s22 = smov 15   ;;  %v831_v4 = vsel %vm762_vm2, %v746_v2, 0 }
  0x45   : > { %vm546_vm0 = vcmp.lt.s32.totalorder %v2694_v10, 4  ;;  %s2527_s20 = smov 16   ;;  %s2528_s23 = smov 17   ;;  %vm1338_vm3 = vcmp.lt.s32.totalorder %v2694_v10, 112  ;;  %vm1286_vm4 = vcmp.lt.s32.totalorder %v2694_v10, 113  ;;  %vm1234_vm5 = vcmp.lt.s32.totalorder %v2694_v10, 127 }
  0x46   : > { %v2697_v15 = vsel %vm546_vm0, 0.0, %v2521_v14  ;;  %s2529_s21 = smov 111   ;;  %vm1155_vm6 = vcmp.lt.s32.totalorder %v2694_v10, 1  ;;  %vm1103_vm7 = vcmp.lt.s32.totalorder %v2694_v10, 15  ;;  %vm1051_vm8 = vcmp.lt.s32.totalorder %v2694_v10, 16  ;;  %p2019_p13 = scmp.eq.s32.totalorder %s2498_s28, 1 }
  0x47   : > { %v2685_v7 = vld [vmem:[%s2682_s11] sm:$0xff]  ;;  %v2688_v8 = vld [vmem:[%s2682_s11 + $0x8] sm:$0xff]  ;;  %v2709_v26 = vld [vmem:[%s2682_s11 + $0x10] sm:$0xff]  ;;  %vm1390_vm9 = vcmp.lt.s32.totalorder %v2694_v10, 111  ;;  %vm1000_vm10 = vcmp.lt.s32.totalorder %v2694_v10, 17  ;;  %p2020_p0 = scmp.eq.s32.totalorder %s2494_s27, 1 }
  0x48   : > { %620 = vmatpush.msrb.mxu1 %v2685_v7  ;;  %640 = vmatpush.msrb.mxu3 %v2688_v8  ;;  %v2712_v27 = vld [vmem:[%s2682_s11 + $0x18] sm:$0xff] }
  0x49   : > { %564 = vmatmul.f32.vlgmr.msra.gmra.mxu3 %v2685_v7  ;;  %584 = vmatmul.f32.vlgmr.msra.gmra.mxu1 %v2688_v8  ;;  %p3431_p1 = pnand %p2020_p0, %p2019_p13 }
  0x4a   : > { %682 = vmatpush.xpose.msra.mxu3 %v2704_v25  ;;  %718 = vmatpush.msra.mxu0 %v2709_v26  ;;  %s3949_s15 = sld [smem:[#allocation14_spill]] (!%p3431_p1) }
  0x4b   : > { %738 = vmatpush.msra.mxu1 %v2712_v27  ;;  %663 = vmatmul.f32.vlgmr.msra.gmra.mxu2 %v2709_v26 }
  0x4c   : > { %1330 = vrot.lane.b32.xlu2 %v2685_v7, %s2522_s12 }
  0x54   : > { %1332 = vrot.lane.b32.xlu2 %v2688_v8, %s2522_s12 }
  0x5c   : > { %1278 = vrot.lane.b32.xlu2 %v2685_v7, %s2523_s13 }
  0x64   : > { %1280 = vrot.lane.b32.xlu2 %v2688_v8, %s2523_s13 }
  0x6c   : > { %1291 = vrot.lane.b32.xlu2 %v2675_v5, %s2523_s13 }
  0x74   : > { %1226 = vrot.lane.b32.xlu2 %v2685_v7, %s2524_s14 }
  0x7c   : > { %1241 = vrot.lane.b32.xlu2 %v2678_v6, %s2524_s14 }
  0x84   : > { %1282 = vrot.lane.b32.xlu2 %v2709_v26, %s2523_s13 }
  0x8c   : > { %1153 = vrot.lane.b32.xlu2 %v2712_v27, %s2525_s24 }
  0x94   : > { %1230 = vrot.lane.b32.xlu2 %v2709_v26, %s2524_s14 }
  0x9c   : > { %1101 = vrot.lane.b32.xlu2 %v2712_v27, %s2526_s22 }
  0xa4   : > { %1043 = vrot.lane.b32.xlu2 %v2685_v7, %s2527_s20 }
  0xa6   : > { %v2812_v43 = vpop.permute.xlu2 %1330 }
  0xac   : > { %1062 = vrot.lane.b32.xlu2 %v2704_v25, %s2527_s20 }
  0xae   : > { %v2814_v44 = vpop.permute.xlu2 %1332 }
  0xb4   : > { %992 = vrot.lane.b32.xlu2 %v2685_v7, %s2528_s23 }
  0xb6   : > { %v2816_v45 = vpop.permute.xlu2 %1278 }
  0xbc   : > { %1011 = vrot.lane.b32.xlu2 %v2704_v25, %s2528_s23 }
  0xbe   : > { %v2818_v49 = vpop.permute.xlu2 %1280 }
  0xc4   : > { %1382 = vrot.lane.b32.xlu2 %v2685_v7, %s2529_s21 }
  0xc6   : > { %v585_v11 = vpop.f32.mrf.mxu1  ;;  %v2821_v52 = vpop.permute.xlu2 %1291 }
  0xcc   : > { %v565_v12 = vpop.f32.mrf.mxu3  ;;  %1397 = vrot.lane.b32.xlu2 %v2678_v6, %s2529_s21 }
  0xcd   : > { %v586_v13 = vadd.f32 %v585_v11, %v565_v12 }
  0xce   : > { %v664_v37 = vpop.f32.mrf.mxu2  ;;  %v2823_v53 = vpop.permute.xlu2 %1226 }
  0xcf   : > { %v588_v16 = vmul.f32 0.0625, %v586_v13 }
  0xd1   : > { %v589_v17 = vadd.f32 %v588_v16, %v2697_v15 }
  0xd3   : > { %v591_v18 = vsel %vm590_vm1, %v589_v17, -inf }
  0xd4   : > { %592 = vmax.xlane.f32.xlu0 %v591_v18  ;;  %1336 = vrot.lane.b32.xlu2 %v2712_v27, %s2522_s12  ;;  %v2902_v18 = vld [vmem:[%s3814_s7 + $0x1c] sm:$0xf] }
  0xd6   : > { %v2827_v54 = vpop.permute.xlu2 %1241 }
  0xdc   : > { %1007 = vrot.lane.b32.xlu2 %v2678_v6, %s2528_s23 }
  0xde   : > { %v2831_v55 = vpop.permute.xlu2 %1282 }
  0xe4   : > { %1386 = vrot.lane.b32.xlu2 %v2709_v26, %s2529_s21 }
  0xe6   : > { %v2835_v56 = vpop.permute.xlu2 %1153 }
  0xec   : > { %1245 = vrot.lane.b32.xlu2 %v2704_v25, %s2524_s14 }
  0xee   : > { %v2839_v57 = vpop.permute.xlu2 %1230 }
  0xf4   : > { %1099 = vrot.lane.b32.xlu2 %v2709_v26, %s2526_s22 }
  0xf6   : > { %v2845_v58 = vpop.permute.xlu2 %1101 }
  0xf7   : > { %3863 = vst [vmem:[#allocation15_spill] sm:$0xff] %v2845_v58 }
  0xfc   : > { %1060 = vrot.lane.b32.xlu2 %v2702_v24, %s2527_s20 }
  0xfe   : > { %v2849_v59 = vpop.permute.xlu2 %1043 }
  0xff   : > { %3864 = vst [vmem:[#allocation16_spill] sm:$0xff] %v2849_v59 }
 0x104   : > { %1388 = vrot.lane.b32.xlu2 %v2712_v27, %s2529_s21 }
 0x106   : > { %v2855_v61 = vpop.permute.xlu2 %1062 }
 0x107   : > { %3865 = vst [vmem:[#allocation17_spill] sm:$0xff] %v2855_v61 }
 0x10e   : > { %v2861_v63 = vpop.permute.xlu2 %992 }
 0x10f   : > { %3866 = vst [vmem:[#allocation18_spill] sm:$0xff] %v2861_v63 }
 0x116   : > { %v2869_v1 = vpop.permute.xlu2 %1011 }
 0x117   : > { %3867 = vst [vmem:[#allocation19_spill] sm:$0xff] %v2869_v1 }
 0x11e   : > { %v2885_v12 = vpop.permute.xlu2 %1382 }
 0x126   : > { %v2893_v16 = vpop.permute.xlu2 %1397 }
 0x147   : > { %v593_v19 = vpop.xlane.xlu0 %592 }
 0x148   : > { %v594_v20 = vsub.f32 %v589_v17, %v593_v19  ;;  %v2908_v19 = vld [vmem:[%s3814_s7 + $0x18] sm:$0xf] }
 0x14a   : > { %v595_v21 = vmul.f32 1.442695, %v594_v20  ;;  %v1358_v20 = vperm.slane %v2902_v18, 0 }
 0x14c   : > { %2376 = vpow2.f32 %v595_v21  ;;  %v2912_v21 = vpop.permute.xlu2 %1336 }
 0x152   : > { %v2377_v22 = vpop.eup %2376 }
 0x153   : > { %v597_v23 = vsel %vm590_vm1, %v2377_v22, 0.0 }
 0x154   : > { %598 = vadd.xlane.f32.xlu0 %v597_v23  ;;  %v1306_v23 = vperm.slane %v2908_v19, 0 }
 0x168   : > { %1343 = vrot.lane.b32.xlu0 %v2675_v5, %s2522_s12 }
 0x170   : > { %1293 = vrot.lane.b32.xlu0 %v2678_v6, %s2523_s13 }
 0x178   : > { %1239 = vrot.lane.b32.xlu0 %v2675_v5, %s2524_s14 }
 0x180   : > { %1347 = vrot.lane.b32.xlu0 %v2702_v24, %s2522_s12 }
 0x188   : > { %1147 = vrot.lane.b32.xlu0 %v2685_v7, %s2525_s24 }
 0x190   : > { %1166 = vrot.lane.b32.xlu0 %v2704_v25, %s2525_s24 }
 0x198   : > { %1095 = vrot.lane.b32.xlu0 %v2685_v7, %s2526_s22 }
 0x1a0   : > { %1114 = vrot.lane.b32.xlu0 %v2704_v25, %s2526_s22 }
 0x1a8   : > { %1056 = vrot.lane.b32.xlu0 %v2675_v5, %s2527_s20 }
 0x1b0   : > { %1162 = vrot.lane.b32.xlu0 %v2678_v6, %s2525_s24 }
 0x1b8   : > { %1005 = vrot.lane.b32.xlu0 %v2675_v5, %s2528_s23 }
 0x1c0   : > { %1110 = vrot.lane.b32.xlu0 %v2678_v6, %s2526_s22 }
 0x1c7   : > { %v599_v28 = vpop.xlane.xlu0 %598 }
 0x1c8   : > { %2378 = vrcp.f32 %v599_v28  ;;  %1395 = vrot.lane.b32.xlu0 %v2675_v5, %s2529_s21 }
 0x1ce   : > { %v2379_v29 = vpop.eup %2378 }
 0x1cf   : > { %v601_v30 = vmul.f32 %v2379_v29, %v2377_v22  ;;  %v1341_v22 = vsel %vm1338_vm3, %v2812_v43, %v2814_v44  ;;  %v1289_v29 = vsel %vm1286_vm4, %v2816_v45, %v2818_v49 }
 0x1d0   : > { %1058 = vrot.lane.b32.xlu0 %v2678_v6, %s2527_s20 }
 0x1d1   : > { %2237 = vmatmul.msk.f32.vlgmr.msrb.gmra.mxu1 %vm590_vm1, %v601_v30  ;;  %2238 = vmatmul.msk.f32.vlgmr.msrb.gmra.mxu3 %vm590_vm1, %v601_v30 }
 0x1d8   : > { %994 = vrot.lane.b32.xlu0 %v2688_v8, %s2528_s23 }
 0x1d9   : > { %683 = vmatmul.f32.vlgmr.msra.gmra.mxu3 %v2712_v27 }
 0x1da   : > { %v2851_v60 = vpop.permute.xlu0 %1343 }
 0x1e0   : > { %1297 = vrot.lane.b32.xlu0 %v2704_v25, %s2523_s13 }
 0x1e2   : > { %v2859_v62 = vpop.permute.xlu0 %1293 }
 0x1e3   : > { %v1301_v30 = vsel %vm1286_vm4, %v2821_v52, %v2859_v62 }
 0x1e8   : > { %1232 = vrot.lane.b32.xlu0 %v2712_v27, %s2524_s14 }
 0x1ea   : > { %v2865_v0 = vpop.permute.xlu0 %1239 }
 0x1f0   : > { %1164 = vrot.lane.b32.xlu0 %v2702_v24, %s2525_s24 }
 0x1f2   : > { %v2873_v3 = vpop.permute.xlu0 %1347 }
 0x1f8   : > { %1047 = vrot.lane.b32.xlu0 %v2709_v26, %s2527_s20 }
 0x1fa   : > { %v2887_v13 = vpop.permute.xlu0 %1147 }
 0x200   : > { %1009 = vrot.lane.b32.xlu0 %v2702_v24, %s2528_s23 }
 0x202   : > { %v2897_v17 = vpop.permute.xlu0 %1166 }
 0x24e   : > { %v622_v31 = vpop.f32.mrf.mxu1 }
 0x24f   : > { %v755_v32 = vpack.c.bf16 %v622_v31, %v622_v31  ;;  %v2932_v31 = vld [vmem:[%s3814_s7 + $0x14] sm:$0xf] }
 0x251   : > { %v764_v33 = vsel %vm762_vm2, %v755_v32, 0 }
 0x252   : > { %782 = vmatpush.bf16.msrb.mxu2 %v764_v33  ;;  %v1366_v33 = vmul.f32 %v1358_v20, %v1341_v22 }
 0x254   : > { %v642_v34 = vpop.f32.mrf.mxu3 }
 0x255   : > { %v756_v35 = vpack.c.bf16 %v642_v34, %v642_v34  ;;  %2241 = vmatmul.msk.bf16.vlgmr.msrb.gmra.mxu2 %vm590_vm1, %v2877_v9  ;;  %v2938_v34 = vpop.permute.xlu0 %1095 }
 0x256   : > { %849 = vmatpush.bf16.msra.mxu2 %v831_v4 }
 0x257   : > { %v767_v36 = vsel %vm762_vm2, %v756_v35, 0 }
 0x258   : > { %795 = vmatpush.bf16.msrb.mxu3 %v767_v36  ;;  %v2943_v36 = vld [vmem:[%s3814_s7 + $0x10] sm:$0xf] }
 0x25b   : > { %2242 = vmatmul.msk.bf16.vlgmr.msrb.gmra.mxu3 %vm590_vm1, %v2877_v9 }
 0x25c   : > { %v684_v38 = vpop.f32.mrf.mxu3 }
 0x25d   : > { %v685_v39 = vadd.f32 %v684_v38, %v664_v37  ;;  %v1314_v37 = vmul.f32 %v1306_v23, %v1289_v29  ;;  %v1322_v38 = vmul.f32 %v1306_v23, %v1301_v30 }
 0x25f   : > { %v687_v40 = vmul.f32 0.0625, %v685_v39  ;;  %v1254_v39 = vperm.slane %v2932_v31, 0 }
 0x261   : > { %v688_v41 = vadd.f32 %v687_v40, %v2697_v15 }
 0x263   : > { %v689_v42 = vsel %vm590_vm1, %v688_v41, -inf }
 0x264   : > { %690 = vmax.xlane.f32.xlu1 %v689_v42  ;;  %v2950_v42 = vpop.permute.xlu2 %1007 }
 0x265   : > { %3868 = vst [vmem:[#allocation20_spill] sm:$0xff] %v2950_v42 }
 0x26c   : > { %v2968_v29 = vpop.permute.xlu2 %1386 }
 0x2d7   : > { %v691_v46 = vpop.xlane.xlu1 %690 }
 0x2d8   : > { %v692_v47 = vsub.f32 %v688_v41, %v691_v46  ;;  %v1249_v41 = vsel %vm1234_vm5, %v2865_v0, %v2827_v54  ;;  %v1202_v46 = vperm.slane %v2943_v36, 0 }
 0x2da   : > { %v693_v48 = vmul.f32 1.442695, %v692_v47  ;;  %v1270_v47 = vmul.f32 %v1254_v39, %v1249_v41  ;;  %v1210_v4 = vmul.f32 %v1202_v46, %v2685_v7  ;;  %v3005_v41 = vpop.permute.xlu2 %1245 }
 0x2dc   : > { %2380 = vpow2.f32 %v693_v48 }
 0x2e2   : > { %v2381_v50 = vpop.eup %2380 }
 0x2e3   : > { %v695_v51 = vsel %vm590_vm1, %v2381_v50, 0.0 }
 0x2e4   : > { %696 = vadd.xlane.f32.xlu1 %v695_v51 }
 0x2fd   : > { %1345 = vrot.lane.b32.xlu1 %v2678_v6, %s2522_s12 }
 0x305   : > { %1228 = vrot.lane.b32.xlu1 %v2688_v8, %s2524_s14 }
 0x30d   : > { %1334 = vrot.lane.b32.xlu1 %v2709_v26, %s2522_s12 }
 0x315   : > { %1295 = vrot.lane.b32.xlu1 %v2702_v24, %s2523_s13 }
 0x31d   : > { %1160 = vrot.lane.b32.xlu1 %v2675_v5, %s2525_s24 }
 0x325   : > { %1243 = vrot.lane.b32.xlu1 %v2702_v24, %s2524_s14 }
 0x32d   : > { %1108 = vrot.lane.b32.xlu1 %v2675_v5, %s2526_s22 }
 0x335   : > { %1049 = vrot.lane.b32.xlu1 %v2712_v27, %s2527_s20 }
 0x33d   : > { %1149 = vrot.lane.b32.xlu1 %v2688_v8, %s2525_s24 }
 0x345   : > { %998 = vrot.lane.b32.xlu1 %v2712_v27, %s2528_s23 }
 0x34d   : > { %1097 = vrot.lane.b32.xlu1 %v2688_v8, %s2526_s22 }
 0x355   : > { %1384 = vrot.lane.b32.xlu1 %v2688_v8, %s2529_s21 }
 0x357   : > { %v697_v11 = vpop.xlane.xlu1 %696 }
 0x358   : > { %2382 = vrcp.f32 %v697_v11  ;;  %v1218_v11 = vmul.f32 %v1202_v46, %v2675_v5 }
 0x35a   : > { %v1526_v23 = vpack.c.bf16 %v1218_v11, %v1210_v4 }
 0x35d   : > { %1045 = vrot.lane.b32.xlu1 %v2688_v8, %s2527_s20 }
 0x35e   : > { %v2383_v14 = vpop.eup %2382 }
 0x35f   : > { %v699_v15 = vmul.f32 %v2383_v14, %v2381_v50  ;;  %v1534_v50 = vpack.c.bf16 %v1322_v38, %v1314_v37  ;;  %v2960_v14 = vpop.permute.xlu0 %1114  ;;  %v1288_v37 = vsel %vm1286_vm4, %v2818_v49, %v2831_v55 }
 0x360   : > { %3869 = vst [vmem:[#allocation21_spill] sm:$0xff] %v2960_v14 }
 0x361   : > { %2239 = vmatmul.msk.f32.vlgmr.msra.gmra.mxu0 %vm590_vm1, %v699_v15  ;;  %2240 = vmatmul.msk.f32.vlgmr.msra.gmra.mxu1 %vm590_vm1, %v699_v15  ;;  %v1359_v15 = vperm.slane %v2902_v18, 1 }
 0x365   : > { %1349 = vrot.lane.b32.xlu1 %v2704_v25, %s2522_s12 }
 0x36d   : > { %1284 = vrot.lane.b32.xlu1 %v2712_v27, %s2523_s13 }
 0x36f   : > { %v1346_v28 = vpop.permute.xlu1 %1345 }
 0x370   : > { %v1353_v32 = vsel %vm1338_vm3, %v2851_v60, %v1346_v28  ;;  %v1352_v22 = vsel %vm1338_vm3, %v1346_v28, %v2873_v3 }
 0x371   : > { %v1374_v35 = vmul.f32 %v1358_v20, %v1353_v32  ;;  %v2970_v30 = vmul.f32 %v1359_v15, %v1352_v22 }
 0x373   : > { %v1538_v40 = vpack.c.bf16 %v1374_v35, %v1366_v33  ;;  %v1307_v33 = vperm.slane %v2908_v19, 1  ;;  %v2983_v35 = vpop.permute.xlu0 %1056 }
 0x374   : > { %3870 = vst [vmem:[#allocation22_spill] sm:$0xff] %v2983_v35 }
 0x375   : > { %1399 = vrot.lane.b32.xlu1 %v2702_v24, %s2529_s21  ;;  %1595 = vmatpush.bf16.msrb.mxu2 %v1538_v40  ;;  %v3002_v40 = vmul.f32 %v1307_v33, %v1288_v37  ;;  %v3039_v37 = vld [vmem:[%s3814_s7 + $0x8] sm:$0xf] }
 0x377   : > { %v1229_v48 = vpop.permute.xlu1 %1228 }
 0x378   : > { %v1237_v51 = vsel %vm1234_vm5, %v2823_v53, %v1229_v48 }
 0x379   : > { %v1262_v2 = vmul.f32 %v1254_v39, %v1237_v51  ;;  %1596 = vmatpush.bf16.msrb.mxu2 %v1534_v50  ;;  %v1159_v50 = vsel %vm1155_vm6, %v2835_v56, %v2887_v13 }
 0x37b   : > { %v1530_v20 = vpack.c.bf16 %v1270_v47, %v1262_v2  ;;  %v3018_v51 = vpop.permute.xlu0 %1162 }
 0x37d   : > { %1151 = vrot.lane.b32.xlu1 %v2709_v26, %s2525_s24  ;;  %1597 = vmatpush.bf16.msrb.mxu2 %v1530_v20  ;;  %v3026_v20 = vpop.permute.xlu2 %1099 }
 0x37e   : > { %3871 = vst [vmem:[#allocation23_spill] sm:$0xff] %v3026_v20 }
 0x37f   : > { %v2972_v7 = vpop.permute.xlu1 %1334 }
 0x380   : > { %v1340_v5 = vsel %vm1338_vm3, %v2814_v44, %v2972_v7  ;;  %v2996_v44 = vld [vmem:[%s3814_s7 + $0xc] sm:$0xf] }
 0x381   : > { %v2978_v32 = vmul.f32 %v1359_v15, %v1340_v5  ;;  %1598 = vmatpush.bf16.msrb.mxu2 %v1526_v23  ;;  %v1175_v49 = vperm.slane %v2996_v44, 0  ;;  %v1255_v23 = vperm.slane %v2932_v31, 1  ;;  %v1236_v5 = vsel %vm1234_vm5, %v1229_v48, %v2839_v57 }
 0x382   : > { %v747_v48 = vpack.c.bf16 %v2678_v6, %v2678_v6 }
 0x385   : > { %1112 = vrot.lane.b32.xlu1 %v2702_v24, %s2526_s22 }
 0x387   : > { %v2991_v38 = vpop.permute.xlu1 %1295 }
 0x388   : > { %v1300_v39 = vsel %vm1286_vm4, %v2859_v62, %v2991_v38  ;;  %v1183_v62 = vmul.f32 %v1175_v49, %v1159_v50 }
 0x389   : > { %v3007_v46 = vmul.f32 %v1307_v33, %v1300_v39 }
 0x38d   : > { %996 = vrot.lane.b32.xlu1 %v2709_v26, %s2528_s23 }
 0x38f   : > { %v1161_v2 = vpop.permute.xlu1 %1160 }
 0x390   : > { %v1170_v4 = vsel %vm1155_vm6, %v1161_v2, %v3018_v51  ;;  %v1171_v11 = vsel %vm1155_vm6, %v2897_v17, %v1161_v2  ;;  %v1123_v2 = vperm.slane %v3039_v37, 0 }
 0x391   : > { %v1191_v15 = vmul.f32 %v1175_v49, %v1171_v11  ;;  %v3046_v49 = vmul.f32 %v1255_v23, %v1236_v5  ;;  %v834_v11 = vsel %vm762_vm2, %v747_v48, 0  ;;  %v3067_v5 = vpop.permute.xlu0 %1005  ;;  %v3076_v48 = vld [vmem:[%s3814_s7 + $0x4] sm:$0xf] }
 0x392   : > { %862 = vmatpush.bf16.msra.mxu3 %v834_v11 }
 0x393   : > { %v1522_v22 = vpack.c.bf16 %v1191_v15, %v1183_v62  ;;  %v3050_v62 = vpop.permute.xlu2 %1060 }
 0x394   : > { %3872 = vst [vmem:[#allocation24_spill] sm:$0xff] %v3050_v62 }
 0x395   : > { %1401 = vrot.lane.b32.xlu1 %v2704_v25, %s2529_s21  ;;  %1599 = vmatpush.bf16.msrb.mxu2 %v1522_v22  ;;  %v3063_v22 = vld [vmem:[%s2655_s18] sm:$0xf] }
 0x396   : > { %3873 = vst [vmem:[#allocation25_spill] sm:$0xff] %v3063_v22  ;;  %2245 = vmatmul.msk.bf16.vlgmr.msra.gmra.mxu2 %vm590_vm1, %v3063_v22  ;;  %2246 = vmatmul.msk.bf16.vlgmr.msra.gmra.mxu3 %vm590_vm1, %v3063_v22  ;;  %v1071_v22 = vperm.slane %v3076_v48, 0 }
 0x397   : > { %v3034_v33 = vpop.permute.xlu1 %1243 }
 0x398   : > { %v1248_v39 = vsel %vm1234_vm5, %v2827_v54, %v3034_v33  ;;  %v1107_v54 = vsel %vm1103_vm7, %v2845_v58, %v2938_v34 }
 0x399   : > { %v3048_v50 = vmul.f32 %v1255_v23, %v1248_v39  ;;  %v1131_v23 = vmul.f32 %v1123_v2, %v1107_v54  ;;  %v3086_v54 = vld [vmem:[%s3814_s7 + $0x20] sm:$0xf] }
 0x39a   : > { %v3833_v28 = vperm.slane %v3086_v54, 2  ;;  %v3832_v62 = vperm.slane %v3086_v54, 3 }
 0x39b   : > { %v1389_v47 = vpop.permute.xlu2 %1388 }
 0x39f   : > { %v3069_v39 = vpop.permute.xlu1 %1108 }
 0x3a0   : > { %3874 = vst [vmem:[#allocation26_spill] sm:$0xff] %v3069_v39  ;;  %v1119_v11 = vsel %vm1103_vm7, %v2960_v14, %v3069_v39  ;;  %v1391_v14 = vsel %vm1390_vm9, %v2968_v29, %v1389_v47  ;;  %v1067_v39 = vsel %vm1051_vm8, %v2855_v61, %v2983_v35  ;;  %v3116_v35 = vpop.permute.xlu0 %1110 }
 0x3a1   : > { %v1139_v15 = vmul.f32 %v1123_v2, %v1119_v11  ;;  %v1394_v2 = vsel %vm1390_vm9, %v1389_v47, %v2885_v12  ;;  %v3104_v11 = vmul.f32 %v3833_v28, %v1391_v14  ;;  %v1176_v14 = vperm.slane %v2996_v44, 1 }
 0x3a3   : > { %v1518_v42 = vpack.c.bf16 %v1139_v15, %v1131_v23  ;;  %3875 = vst [vmem:[#allocation27_spill] sm:$0xff] %v3104_v11  ;;  %v3108_v15 = vmul.f32 %v3832_v62, %v1394_v2  ;;  %v1087_v23 = vmul.f32 %v1071_v22, %v1067_v39  ;;  %v3124_v39 = vld [vmem:[%s3814_s7] sm:$0xf]  ;;  %v1016_v62 = vsel %vm1000_vm10, %v2869_v1, %v3067_v5 }
 0x3a5   : > { %1600 = vmatpush.bf16.msrb.mxu2 %v1518_v42  ;;  %3876 = vst [vmem:[#allocation28_spill] sm:$0xff] %v3108_v15  ;;  %v2303_v15 = vld [vmem:[%s2645_s8 + $0x4] sm:$0xf0] }
 0x3a7   : > { %v3110_v20 = vpop.permute.xlu1 %1049 }
 0x3a8   : > { %3877 = vst [vmem:[#allocation29_spill] sm:$0xff] %v3110_v20  ;;  %v1055_v61 = vsel %vm1051_vm8, %v3110_v20, %v2849_v59  ;;  %v2305_v59 = vld [vmem:[%s2645_s8 + $0x14] sm:$0xf0] }
 0x3a9   : > { %v1079_v47 = vmul.f32 %v1071_v22, %v1055_v61  ;;  %v3131_v61 = vmul.f32 %v1176_v14, %v1170_v4 }
 0x3ab   : > { %v1514_v58 = vpack.c.bf16 %v1087_v23, %v1079_v47  ;;  %3878 = vst [vmem:[#allocation30_spill] sm:$0xff] %v3131_v61  ;;  %v3136_v23 = vpop.permute.xlu0 %1395  ;;  %v2271_v61 = vld [vmem:[%s2645_s8 + $0x10] sm:$0xf] }
 0x3ac   : > { %3880 = vst [vmem:[#allocation32_spill] sm:$0xff] %v3136_v23 }
 0x3ad   : > { %1601 = vmatpush.bf16.msrb.mxu2 %v1514_v58  ;;  %v1019_v58 = vperm.slane %v3124_v39, 0 }
 0x3af   : > { %v3119_v42 = vpop.permute.xlu1 %1149 }
 0x3b0   : > { %v1158_v2 = vsel %vm1155_vm6, %v2887_v13, %v3119_v42  ;;  %v1035_v13 = vmul.f32 %v1019_v58, %v1016_v62  ;;  %v1410_v62 = vperm.slane %v3086_v54, 0 }
 0x3b1   : > { %v3133_v22 = vmul.f32 %v1176_v14, %v1158_v2  ;;  %v2263_v2 = vld [vmem:[%s2645_s8] sm:$0xf] }
 0x3b2   : > { %v3152_v20 = vor.u32 %v2303_v15, %v2263_v2  ;;  %v1405_v15 = vsel %vm1390_vm9, %v3136_v23, %v2893_v16  ;;  %v2302_v2 = vld [vmem:[%s2645_s8 + $0x4] sm:$0xf] }
 0x3b3   : > { %3879 = vst [vmem:[#allocation31_spill] sm:$0xff] %v3133_v22  ;;  %v3154_v47 = vpop.permute.xlu0 %1058  ;;  %v2265_v22 = vld [vmem:[%s2645_s8 + $0x8] sm:$0xf0] }
 0x3b4   : > { %3882 = vst [vmem:[#allocation34_spill] sm:$0xff] %v3152_v20  ;;  %v3177_v23 = vor.u32 %v2302_v2, %v2265_v22  ;;  %v1309_v2 = vperm.slane %v2908_v19, 3 }
 0x3b6   : > { %3883 = vst [vmem:[#allocation35_spill] sm:$0xff] %v3177_v23 }
 0x3b7   : > { %v3144_v28 = vpop.permute.xlu1 %998 }
 0x3b8   : > { %3881 = vst [vmem:[#allocation33_spill] sm:$0xff] %v3144_v28  ;;  %v1004_v4 = vsel %vm1000_vm10, %v3144_v28, %v2861_v63  ;;  %v2530_v28 = vmov 0  }
 0x3b9   : > { %v1027_v14 = vmul.f32 %v1019_v58, %v1004_v4  ;;  %2373 = vset.pattern.permute.xlu0 %v2530_v28  ;;  %v894_v58 = vld [vmem:[%s2665_s19] sm:$0xff]  ;;  %2375 = vset.pattern.permute.xlu1 %v2530_v28  ;;  %s3915_s19 = sld [smem:[#allocation39_spill]] }
 0x3ba   : > { %897 = vperm.xlu0 %2373, %v894_v58   ;;  %2374 = vset.pattern.permute.xlu2 %v2530_v28  ;;  %v3179_v28 = vor.u32 %v2305_v59, %v2271_v61  ;;  %v1342_v59 = vsel %vm1338_vm3, %v2912_v21, %v2812_v43  ;;  %v1339_v61 = vsel %vm1338_vm3, %v2972_v7, %v2912_v21  ;;  %v1308_v7 = vperm.slane %v2908_v19, 2 }
 0x3bb   : > { %v1510_v11 = vpack.c.bf16 %v1035_v13, %v1027_v14  ;;  %v3165_v13 = vpop.permute.xlu0 %994  ;;  %v1250_v19 = vsel %vm1234_vm5, %v3005_v41, %v2865_v0  ;;  %v1247_v0 = vsel %vm1234_vm5, %v3034_v33, %v3005_v41  ;;  %v1204_v41 = vperm.slane %v2943_v36, 2 }
 0x3bc   : > { %3884 = vst [vmem:[#allocation36_spill] sm:$0xff] %v3179_v28 }
 0x3bd   : > { %1602 = vmatpush.bf16.msrb.mxu2 %v1510_v11  ;;  %v1426_v11 = vmul.f32 %v1410_v62, %v1405_v15 }
 0x3bf   : > { %v3156_v1 = vpop.permute.xlu1 %1097 }
 0x3c0   : > { %1603 = vmatmul.bf16.vlgmr.msrb.gmra.mxu2 %v3152_v20 }
 0x3c3   : > { %v3914_v10 = vld [vmem:[#allocation36_spill] sm:$0xff] }
 0x3c7   : > { %v3167_v4 = vpop.permute.xlu1 %1384 }
 0x3c8   : > { %v1393_v14 = vsel %vm1390_vm9, %v2885_v12, %v3167_v4  ;;  %v1298_v12 = vpop.permute.xlu0 %1297 }
 0x3c9   : > { %v1418_v20 = vmul.f32 %v1410_v62, %v1393_v14  ;;  %v1546_v62 = vld [vmem:[%s2650_s26] sm:$0xff]  ;;  %v1302_v21 = vsel %vm1286_vm4, %v1298_v12, %v2821_v52  ;;  %v1257_v52 = vperm.slane %v2932_v31, 3 }
 0x3ca   : > { %1552 = vperm.xlu1 %2375, %v1546_v62  }
 0x3cb   : > { %v1542_v63 = vpack.c.bf16 %v1426_v11, %v1418_v20  ;;  %v1361_v20 = vperm.slane %v2902_v18, 3 }
 0x3cd   : > { %1621 = vmatpush.bf16.msrb.mxu3 %v1542_v63  ;;  %v1360_v63 = vperm.slane %v2902_v18, 2  ;;  %v1369_v15 = vmul.f32 %v1361_v20, %v1342_v59 }
 0x3cf   : > { %v3181_v58 = vpop.permute.xlu1 %1045  ;;  %v1368_v43 = vmul.f32 %v1360_v63, %v1339_v61  ;;  %v748_v61 = vpack.c.bf16 %v2702_v24, %v2702_v24 }
 0x3d0   : > { %3885 = vst [vmem:[#allocation37_spill] sm:$0xff] %v3181_v58  ;;  %2277 = vmatmul.msk.bf16.vlgmr.msrb.gmra.mxu3 %vm1588_vm11, %v3177_v23  ;;  %1608 = vmatmul.bf16.gmra.mxu2 %v3179_v28  ;;  %v2304_v28 = vld [vmem:[%s2645_s8 + $0x14] sm:$0xf]  ;;  %v2273_v23 = vld [vmem:[%s2645_s8 + $0x18] sm:$0xf0]  ;;  %v1233_v59 = vpop.permute.xlu0 %1232 }
 0x3d7   : > { %v1350_v22 = vpop.permute.xlu1 %1349 }
 0x3d8   : > { %v1351_v11 = vsel %vm1338_vm3, %v2873_v3, %v1350_v22  ;;  %v1354_v14 = vsel %vm1338_vm3, %v1350_v22, %v2851_v60  ;;  %v1299_v3 = vsel %vm1286_vm4, %v2991_v38, %v1298_v12  ;;  %v1325_v22 = vmul.f32 %v1309_v2, %v1302_v21 }
 0x3d9   : > { %v1376_v62 = vmul.f32 %v1360_v63, %v1351_v11  ;;  %v1377_v18 = vmul.f32 %v1361_v20, %v1354_v14  ;;  %v3215_v63 = vor.u32 %v2304_v28, %v2273_v23  ;;  %v749_v20 = vpack.c.bf16 %v2704_v25, %v2704_v25 }
 0x3da   : > { %v1256_v38 = vperm.slane %v2932_v31, 2  ;;  %v1235_v23 = vsel %vm1234_vm5, %v2839_v57, %v1233_v59  ;;  %v1238_v28 = vsel %vm1234_vm5, %v1233_v59, %v2823_v53  ;;  %v1324_v12 = vmul.f32 %v1308_v7, %v1299_v3 }
 0x3db   : > { %v1540_v58 = vpack.c.bf16 %v1376_v62, %v1368_v43  ;;  %v1541_v60 = vpack.c.bf16 %v1377_v18, %v1369_v15  ;;  %v837_v31 = vsel %vm762_vm2, %v748_v61, 0  ;;  %v1547_v62 = vld [vmem:[%s2650_s26 + $0x8] sm:$0xff]  ;;  %v840_v18 = vsel %vm762_vm2, %v749_v20, 0 }
 0x3dc   : > { %1557 = vperm.xlu2 %2374, %v1547_v62   ;;  %v1273_v61 = vmul.f32 %v1257_v52, %v1250_v19  ;;  %v1264_v20 = vmul.f32 %v1256_v38, %v1235_v23 }
 0x3dd   : > { %1671 = vmatpush.bf16.msra.mxu3 %v1540_v58  ;;  %1709 = vmatpush.bf16.msra.mxu2 %v1541_v60 }
 0x3de   : > { %v720_v15 = vpop.f32.mrf.mxu0  ;;  %v740_v11 = vpop.f32.mrf.mxu1 }
 0x3df   : > { %v757_v58 = vpack.c.bf16 %v720_v15, %v720_v15  ;;  %v758_v14 = vpack.c.bf16 %v740_v11, %v740_v11  ;;  %v1285_v43 = vpop.permute.xlu1 %1284  ;;  %v1265_v15 = vmul.f32 %v1257_v52, %v1238_v28  ;;  %v1272_v11 = vmul.f32 %v1256_v38, %v1247_v0  ;;  %v1549_v38 = vld [vmem:[%s2650_s26 + $0x18] sm:$0xff]  ;;  %v1165_v28 = vpop.permute.xlu0 %1164 }
 0x3e0   : > { %v1287_v57 = vsel %vm1286_vm4, %v2831_v55, %v1285_v43  ;;  %v1290_v53 = vsel %vm1286_vm4, %v1285_v43, %v2816_v45  ;;  %2278 = vmatmul.msk.bf16.gmra.mxu3 %vm1588_vm11, %v3215_v63  ;;  %v1205_v55 = vperm.slane %v2943_v36, 3  ;;  %v1411_v43 = vperm.slane %v3086_v54, 1  ;;  %1567 = vperm.xlu1 %2375, %v1549_v38  }
 0x3e1   : > { %v773_v33 = vsel %vm762_vm2, %v758_v14, 0  ;;  %v1316_v21 = vmul.f32 %v1308_v7, %v1287_v57  ;;  %v1317_v59 = vmul.f32 %v1309_v2, %v1290_v53  ;;  %v770_v3 = vsel %vm762_vm2, %v757_v58, 0 }
 0x3e2   : > { %808 = vmatpush.bf16.msrb.mxu0 %v770_v3  ;;  %821 = vmatpush.bf16.msrb.mxu1 %v773_v33  ;;  %v1392_v2 = vsel %vm1390_vm9, %v3167_v4, %v2968_v29  ;;  %v1212_v7 = vmul.f32 %v1204_v41, %v2709_v26  ;;  %v1213_v52 = vmul.f32 %v1205_v55, %v2712_v27  ;;  %v1126_v33 = vperm.slane %v3039_v37, 3 }
 0x3e3   : > { %v1536_v45 = vpack.c.bf16 %v1324_v12, %v1316_v21  ;;  %v1537_v60 = vpack.c.bf16 %v1325_v22, %v1317_v59  ;;  %v1220_v22 = vmul.f32 %v1204_v41, %v2702_v24  ;;  %v1221_v19 = vmul.f32 %v1205_v55, %v2704_v25  ;;  %v3889_v21 = vld [vmem:[#allocation15_spill] sm:$0xff] }
 0x3e4   : > { %v3886_v29 = vpack.c.bf16 %v2970_v30, %v2978_v32  ;;  %v1532_v26 = vpack.c.bf16 %v1272_v11, %v1264_v20  ;;  %v1533_v27 = vpack.c.bf16 %v1273_v61, %v1265_v15  ;;  %v1419_v23 = vmul.f32 %v1411_v43, %v1392_v2  ;;  %v1548_v32 = vld [vmem:[%s2650_s26 + $0x10] sm:$0xff]  ;;  %v3892_v61 = vld [vmem:[#allocation20_spill] sm:$0xff]  ;;  %v3893_v20 = vld [vmem:[#allocation26_spill] sm:$0xff] }
 0x3e5   : > { %2243 = vmatmul.msk.bf16.vlgmr.msrb.gmra.mxu0 %vm590_vm1, %v2877_v9  ;;  %2244 = vmatmul.msk.bf16.vlgmr.msrb.gmra.mxu1 %vm590_vm1, %v2877_v9  ;;  %v1203_v9 = vperm.slane %v2943_v36, 1  ;;  %v1528_v12 = vpack.c.bf16 %v1220_v22, %v1212_v7  ;;  %v1529_v30 = vpack.c.bf16 %v1221_v19, %v1213_v52  ;;  %v3887_v36 = vpack.c.bf16 %v3007_v46, %v3002_v40  ;;  %v3894_v2 = vld [vmem:[#allocation18_spill] sm:$0xff]  ;;  %v3895_v52 = vld [vmem:[#allocation25_spill] sm:$0xff] }
 0x3e6   : > { %875 = vmatpush.bf16.msra.mxu0 %v837_v31  ;;  %888 = vmatpush.bf16.msra.mxu1 %v840_v18  ;;  %v1178_v31 = vperm.slane %v2996_v44, 3  ;;  %v1168_v62 = vsel %vm1155_vm6, %v1165_v28, %v2897_v17  ;;  %v1169_v57 = vsel %vm1155_vm6, %v3018_v51, %v1165_v28  ;;  %v1072_v41 = vperm.slane %v3076_v48, 1  ;;  %v3900_v28 = vld [vmem:[#allocation29_spill] sm:$0xff] }
 0x3e7   : > { %1672 = vmatpush.bf16.msra.mxu3 %v1536_v45  ;;  %1710 = vmatpush.bf16.msra.mxu2 %v1537_v60  ;;  %v3267_v4 = vpop.permute.xlu1 %1399  ;;  %v1211_v58 = vmul.f32 %v1203_v9, %v2688_v8  ;;  %v1219_v14 = vmul.f32 %v1203_v9, %v2678_v6  ;;  %v3888_v8 = vpack.c.bf16 %v3048_v50, %v3046_v49  ;;  %v1048_v49 = vpop.permute.xlu0 %1047  ;;  %v3891_v45 = vld [vmem:[#allocation22_spill] sm:$0xff]  ;;  %v1125_v11 = vperm.slane %v3039_v37, 2  ;;  %v3897_v9 = vld [vmem:[#allocation16_spill] sm:$0xff] }
 0x3e8   : > { %v1404_v24 = vsel %vm1390_vm9, %v2893_v16, %v3267_v4  ;;  %1562 = vperm.xlu2 %2374, %v1548_v32   ;;  %v1177_v16 = vperm.slane %v2996_v44, 2  ;;  %v1194_v53 = vmul.f32 %v1178_v31, %v1168_v62  ;;  %v1106_v50 = vsel %vm1103_vm7, %v2938_v34, %v3156_v1 }
 0x3e9   : > { %v1427_v25 = vmul.f32 %v1411_v43, %v1404_v24  ;;  %v1527_v40 = vpack.c.bf16 %v1219_v14, %v1211_v58  ;;  %v1066_v60 = vsel %vm1051_vm8, %v3891_v45, %v3154_v47  ;;  %v1015_v34 = vsel %vm1000_vm10, %v3067_v5, %v3892_v61  ;;  %v3904_v14 = vld [vmem:[#allocation21_spill] sm:$0xff] }
 0x3ea   : > { %1633 = vmatpush.bf16.msrb.mxu0 %v3886_v29  ;;  %v1193_v46 = vmul.f32 %v1177_v16, %v1169_v57  ;;  %v1118_v15 = vsel %vm1103_vm7, %v3893_v20, %v3116_v35  ;;  %v1020_v43 = vperm.slane %v3124_v39, 1  ;;  %v1003_v7 = vsel %vm1000_vm10, %v3894_v2, %v3165_v13  ;;  %v3896_v29 = vld [vmem:[#allocation37_spill] sm:$0xff] }
 0x3eb   : > { %1673 = vmatpush.bf16.msra.mxu3 %v1532_v26  ;;  %1711 = vmatpush.bf16.msra.mxu2 %v1533_v27  ;;  %v1543_v0 = vpack.c.bf16 %v1427_v25, %v1419_v23  ;;  %v1073_v19 = vperm.slane %v3076_v48, 2  ;;  %v1074_v38 = vperm.slane %v3076_v48, 3  ;;  %v1054_v24 = vsel %vm1051_vm8, %v3897_v9, %v3896_v29  ;;  %v3898_v26 = vld [vmem:[#allocation17_spill] sm:$0xff]  ;;  %v3899_v27 = vld [vmem:[#allocation24_spill] sm:$0xff] }
 0x3ec   : > { %v1064_v23 = vsel %vm1051_vm8, %v3899_v27, %v3898_v26  ;;  %v1065_v25 = vsel %vm1051_vm8, %v3154_v47, %v3899_v27  ;;  %v1052_v48 = vsel %vm1051_vm8, %v1048_v49, %v3900_v28  ;;  %v1053_v58 = vsel %vm1051_vm8, %v3896_v29, %v1048_v49  ;;  %v3912_v26 = vld [vmem:[#allocation27_spill] sm:$0xff] }
 0x3ed   : > { %1659 = vmatpush.bf16.msrb.mxu1 %v1543_v0  ;;  %v1036_v49 = vmul.f32 %v1020_v43, %v1015_v34  ;;  %v3906_v34 = vld [vmem:[#allocation33_spill] sm:$0xff]  ;;  %v3910_v29 = vperm.slane %v3086_v54, 2 }
 0x3ee   : > { %1634 = vmatpush.bf16.msrb.mxu0 %v3887_v36 }
 0x3ef   : > { %1674 = vmatpush.bf16.msra.mxu3 %v1528_v12  ;;  %1712 = vmatpush.bf16.msra.mxu2 %v1529_v30  ;;  %v1152_v6 = vpop.permute.xlu1 %1151  ;;  %v3901_v12 = vld [vmem:[#allocation30_spill] sm:$0xff]  ;;  %v3902_v30 = vld [vmem:[#allocation31_spill] sm:$0xff] }
 0x3f0   : > { %v1156_v44 = vsel %vm1155_vm6, %v1152_v6, %v2835_v56  ;;  %v1157_v17 = vsel %vm1155_vm6, %v3119_v42, %v1152_v6  ;;  %v3890_v56 = vld [vmem:[#allocation23_spill] sm:$0xff]  ;;  %v1124_v42 = vperm.slane %v3039_v37, 1  ;;  %v3903_v32 = vpack.c.bf16 %v3901_v12, %v3902_v30 }
 0x3f1   : > { %v1185_v18 = vmul.f32 %v1177_v16, %v1157_v17  ;;  %v1186_v51 = vmul.f32 %v1178_v31, %v1156_v44  ;;  %v1104_v59 = vsel %vm1103_vm7, %v3890_v56, %v3889_v21  ;;  %v1105_v22 = vsel %vm1103_vm7, %v3156_v1, %v3890_v56  ;;  %v1010_v17 = vpop.permute.xlu0 %1009 }
 0x3f2   : > { %1635 = vmatpush.bf16.msrb.mxu0 %v3888_v8  ;;  %v1132_v5 = vmul.f32 %v1124_v42, %v1106_v50  ;;  %v1134_v37 = vmul.f32 %v1126_v33, %v1104_v59  ;;  %v1140_v1 = vmul.f32 %v1124_v42, %v1118_v15  ;;  %v1133_v36 = vmul.f32 %v1125_v11, %v1105_v22  ;;  %v3908_v22 = vld [vmem:[#allocation34_spill] sm:$0xff] }
 0x3f3   : > { %v1524_v3 = vpack.c.bf16 %v1193_v46, %v1185_v18  ;;  %v1525_v55 = vpack.c.bf16 %v1194_v53, %v1186_v51  ;;  %v1080_v31 = vmul.f32 %v1072_v41, %v1054_v24  ;;  %v1088_v6 = vmul.f32 %v1072_v41, %v1066_v60 }
 0x3f4   : > { %v1519_v8 = vpack.c.bf16 %v1140_v1, %v1132_v5  ;;  %v1090_v44 = vmul.f32 %v1074_v38, %v1064_v23  ;;  %v1082_v46 = vmul.f32 %v1074_v38, %v1052_v48  ;;  %v1081_v53 = vmul.f32 %v1073_v19, %v1053_v58  ;;  %v784_v5 = vpop.f32.mrf.mxu2  ;;  %v3913_v23 = vld [vmem:[#allocation28_spill] sm:$0xff] }
 0x3f5   : > { %2247 = vmatmul.msk.bf16.vlgmr.msra.gmra.mxu0 %vm590_vm1, %v3895_v52  ;;  %2248 = vmatmul.msk.bf16.vlgmr.msra.gmra.mxu1 %vm590_vm1, %v3895_v52  ;;  %v1028_v50 = vmul.f32 %v1020_v43, %v1003_v7  ;;  %v1021_v21 = vperm.slane %v3124_v39, 2  ;;  %v1022_v56 = vperm.slane %v3124_v39, 3  ;;  %v1014_v41 = vsel %vm1000_vm10, %v3892_v61, %v1010_v17  ;;  %v3907_v7 = vld [vmem:[#allocation35_spill] sm:$0xff]  ;;  %v797_v52 = vpop.f32.mrf.mxu3 }
 0x3f6   : > { %1636 = vmatpush.bf16.msrb.mxu0 %v1527_v40  ;;  %1675 = vmatpush.bf16.msra.mxu3 %v1524_v3  ;;  %v1089_v40 = vmul.f32 %v1073_v19, %v1065_v25  ;;  %v1515_v59 = vpack.c.bf16 %v1088_v6, %v1080_v31  ;;  %v3909_v19 = vld [vmem:[#allocation32_spill] sm:$0xff]  ;;  %v3911_v24 = vperm.slane %v3086_v54, 3 }
 0x3f7   : > { %1713 = vmatpush.bf16.msra.mxu2 %v1525_v55  ;;  %v1113_v0 = vpop.permute.xlu1 %1112  ;;  %v1517_v55 = vpack.c.bf16 %v1090_v44, %v1082_v46  ;;  %v1037_v45 = vmul.f32 %v1021_v21, %v1014_v41  ;;  %v1511_v61 = vpack.c.bf16 %v1036_v49, %v1028_v50 }
 0x3f8   : > { %v1116_v16 = vsel %vm1103_vm7, %v1113_v0, %v3904_v14  ;;  %v1117_v47 = vsel %vm1103_vm7, %v3116_v35, %v1113_v0  ;;  %v3905_v35 = vld [vmem:[#allocation19_spill] sm:$0xff]  ;;  %v1516_v3 = vpack.c.bf16 %v1089_v40, %v1081_v53 }
 0x3f9   : > { %v1141_v62 = vmul.f32 %v1125_v11, %v1117_v47  ;;  %v1142_v57 = vmul.f32 %v1126_v33, %v1116_v16  ;;  %v1013_v33 = vsel %vm1000_vm10, %v1010_v17, %v3905_v35  ;;  %v908_v16 = vld [vmem:[%s3915_s19] sm:$0xff] }
 0x3fa   : > { %1637 = vmatpush.bf16.msrb.mxu0 %v3903_v32  ;;  %v1038_v60 = vmul.f32 %v1022_v56, %v1013_v33 }
 0x3fb   : > { %v1520_v18 = vpack.c.bf16 %v1141_v62, %v1133_v36  ;;  %v1521_v51 = vpack.c.bf16 %v1142_v57, %v1134_v37 }
 0x3fd   : > { %1676 = vmatpush.bf16.msra.mxu3 %v1520_v18  ;;  %1714 = vmatpush.bf16.msra.mxu2 %v1521_v51  ;;  %v799_v28 = vpop.f32.mrf.mxu3 }
 0x3fe   : > { %1638 = vmatpush.bf16.msrb.mxu0 %v1519_v8  ;;  %v909_v28 = vld [vmem:[%s3915_s19 + $0x8] sm:$0xff] }
 0x3ff   : > { %v997_v42 = vpop.permute.xlu1 %996 }
 0x400   : > { %v1001_v39 = vsel %vm1000_vm10, %v997_v42, %v3906_v34  ;;  %v1002_v20 = vsel %vm1000_vm10, %v3165_v13, %v997_v42 }
 0x401   : > { %v1029_v15 = vmul.f32 %v1021_v21, %v1002_v20  ;;  %v1030_v11 = vmul.f32 %v1022_v56, %v1001_v39  ;;  %1677 = vmatpush.bf16.msra.mxu3 %v1516_v3  ;;  %1715 = vmatpush.bf16.msra.mxu2 %v1517_v55 }
 0x402   : > { %1639 = vmatpush.bf16.msrb.mxu0 %v1515_v59 }
 0x403   : > { %v1512_v43 = vpack.c.bf16 %v1037_v45, %v1029_v15  ;;  %v1513_v2 = vpack.c.bf16 %v1038_v60, %v1030_v11 }
 0x405   : > { %2279 = vmatmul.msk.bf16.vlgmr.msrb.gmra.mxu1 %vm1588_vm11, %v3907_v7  ;;  %1678 = vmatpush.bf16.msra.mxu3 %v1512_v43 }
 0x406   : > { %1640 = vmatpush.bf16.msrb.mxu0 %v1511_v61  ;;  %1716 = vmatpush.bf16.msra.mxu2 %v1513_v2 }
 0x407   : > { %v1402_v37 = vpop.permute.xlu1 %1401 }
 0x408   : > { %v1403_v13 = vsel %vm1390_vm9, %v3267_v4, %v1402_v37  ;;  %v1406_v38 = vsel %vm1390_vm9, %v1402_v37, %v3909_v19  ;;  %1679 = vmatmul.bf16.vlgmr.msra.gmra.mxu3 %v3908_v22  ;;  %v786_v4 = vpop.f32.mrf.mxu2 }
 0x409   : > { %1641 = vmatmul.bf16.vlgmr.msrb.gmra.mxu0 %v3908_v22  ;;  %v1428_v9 = vmul.f32 %v3910_v29, %v1403_v13  ;;  %v1429_v1 = vmul.f32 %v3911_v24, %v1406_v38  ;;  %1717 = vmatmul.bf16.vlgmr.msra.gmra.mxu2 %v3908_v22 }
 0x40b   : > { %v1544_v27 = vpack.c.bf16 %v1428_v9, %v3912_v26  ;;  %v1545_v25 = vpack.c.bf16 %v1429_v1, %v3913_v23 }
 0x40d   : > { %1697 = vmatpush.bf16.msra.mxu1 %v1544_v27  ;;  %1735 = vmatpush.bf16.msra.mxu0 %v1545_v25 }
 0x415   : > { %2280 = vmatmul.msk.bf16.gmra.mxu1 %vm1588_vm11, %v3215_v63 }
 0x418   : > { %1684 = vmatmul.bf16.gmra.mxu3 %v3914_v10 }
 0x419   : > { %1646 = vmatmul.bf16.gmra.mxu0 %v3914_v10  ;;  %1722 = vmatmul.bf16.gmra.mxu2 %v3914_v10  ;;  %v851_v54 = vpop.f32.mrf.mxu2  ;;  %v864_v48 = vpop.f32.mrf.mxu3 }
 0x41a   : > { %v865_v12 = vadd.f32 %v864_v48, %v797_v52  ;;  %v852_v0 = vadd.f32 %v851_v54, %v784_v5 }
 0x421   : > { %v853_v30 = vpop.f32.mrf.mxu2  ;;  %v866_v32 = vpop.f32.mrf.mxu3 }
 0x425   : > { %2281 = vmatmul.msk.bf16.vlgmr.msra.gmra.mxu1 %vm1588_vm11, %v3907_v7 }
 0x429   : > { %2283 = vmatmul.msk.bf16.vlgmr.msra.gmra.mxu0 %vm1588_vm11, %v3907_v7 }
 0x42c   : > { %v3407_v36 = vpop.permute.xlu0 %897 }
 0x42d   : > { %v900_v58 = vadd.f32 %v3407_v36, %v852_v0  ;;  %v901_v2 = vadd.f32 %v3407_v36, %v865_v12 }
 0x42f   : > { %v904_v14 = vmax.f32 %v900_v58, 0.0  ;;  %v905_v37 = vmax.f32 %v901_v2, 0.0 }
 0x431   : > { %v912_v47 = vadd.f32 %v908_v16, %v904_v14 }
 0x433   : > { %v2249_v31 = vmul.f32 -1.442695, %v912_v47 }
 0x435   : > { %2282 = vmatmul.msk.bf16.gmra.mxu1 %vm1588_vm11, %v3215_v63  ;;  %2384 = vpow2.f32 %v2249_v31 }
 0x436   : > { %v3416_v44 = vpop.permute.xlu2 %1557 }
 0x439   : > { %2284 = vmatmul.msk.bf16.gmra.mxu0 %vm1588_vm11, %v3215_v63 }
 0x43b   : > { %v2385_v63 = vpop.eup %2384 }
 0x43c   : > { %v3413_v57 = vpop.permute.xlu1 %1552  ;;  %v3418_v53 = vadd.f32 1.0, %v2385_v63  ;;  %v540_v63 = vld [vmem:[#allocation3] sm:$0xff] }
 0x43e   : > { %vm937_vm12 = vweird.f32 %v3418_v53  ;;  %v943_v24 = vand.u32 2147483648, %v3418_v53  ;;  %v941_v12 = vand.u32 2147483647, %v3418_v53 }
 0x440   : > { %vm3476_vm3 = vcmp.eq.f32.partialorder %v941_v12, 8.507059e+37 }
 0x442   : > { %v3422_v50 = vpop.permute.xlu2 %1562 }
 0x443   : > { %v1604_v62 = vpop.f32.mrf.mxu2 }
 0x444   : > { %v1605_v8 = vadd.f32 %v1604_v62, %v3413_v57  ;;  %v913_v62 = vadd.f32 %v909_v28, %v905_v37 }
 0x44b   : > { %v1606_v17 = vpop.f32.mrf.mxu2 }
 0x44c   : > { %v1607_v18 = vadd.f32 %v1606_v17, %v3416_v44 }
 0x452   : > { %v3446_v38 = vpop.permute.xlu1 %1567 }
 0x453   : > { %v1623_v6 = vpop.f32.mrf.mxu3  ;;  %v1609_v21 = vpop.f32.mrf.mxu2 }
 0x454   : > { %v1624_v40 = vadd.f32 %v1623_v6, %v1605_v8  ;;  %v1610_v41 = vadd.f32 %v1609_v21, %v3422_v50 }
 0x456   : > { %v2285_v46 = vmul.f32 -1.442695, %v1624_v40 }
 0x458   : > { %2386 = vpow2.f32 %v2285_v46  ;;  %v944_v46 = vor.u32 1.1754944e-38, %v943_v24 }
 0x459   : > { %2388 = vrcp.f32 %v3418_v53 }
 0x45b   : > { %v1625_v51 = vpop.f32.mrf.mxu3  ;;  %v1611_v29 = vpop.f32.mrf.mxu2 }
 0x45c   : > { %v1626_v49 = vadd.f32 %v1625_v51, %v1607_v18  ;;  %v1612_v48 = vadd.f32 %v1611_v29, %v3446_v38 }
 0x45e   : > { %v2387_v56 = vpop.eup %2386  ;;  %v2289_v35 = vmul.f32 -1.442695, %v1626_v49 }
 0x45f   : > { %v3426_v33 = vadd.f32 1.0, %v2387_v56  ;;  %v3429_v59 = vpop.eup %2388 }
 0x460   : > { %2390 = vpow2.f32 %v2289_v35  ;;  %v933_v45 = vmul.f32 %v3429_v59, %v3418_v53  ;;  %vm938_vm13 = vweird.f32 %v3429_v59 }
 0x461   : > { %2392 = vrcp.f32 %v3426_v33  ;;  %vm3460_vm0 = vmor %vm937_vm12, %vm938_vm13  ;;  %vm1768_vm4 = vweird.f32 %v3426_v33  ;;  %v1772_v49 = vand.u32 2147483647, %v3426_v33  ;;  %v1774_v21 = vand.u32 2147483648, %v3426_v33 }
 0x462   : > { %v810_v42 = vpop.f32.mrf.mxu0  ;;  %v823_v3 = vpop.f32.mrf.mxu1  ;;  %v934_v15 = vsub.f32 1.0, %v933_v45 }
 0x463   : > { %v1628_v55 = vpop.f32.mrf.mxu3  ;;  %vm1773_vm10 = vcmp.eq.f32.partialorder %v1772_v49, 8.507059e+37 }
 0x464   : > { %v1629_v60 = vadd.f32 %v1628_v55, %v1610_v41  ;;  %v935_v7 = vmul.f32 %v3429_v59, %v934_v15 }
 0x466   : > { %v2391_v34 = vpop.eup %2390  ;;  %v2293_v39 = vmul.f32 -1.442695, %v1629_v60  ;;  %v936_v9 = vadd.f32 %v3429_v59, %v935_v7 }
 0x467   : > { %v1835_v20 = vadd.f32 1.0, %v2391_v34  ;;  %v3438_v11 = vpop.eup %2392 }
 0x468   : > { %2394 = vpow2.f32 %v2293_v39  ;;  %v1764_v22 = vmul.f32 %v3438_v11, %v3426_v33  ;;  %v940_v40 = vsel %vm3460_vm0, %v3429_v59, %v936_v9  ;;  %vm1769_vm5 = vweird.f32 %v3438_v11 }
 0x469   : > { %2396 = vrcp.f32 %v1835_v20  ;;  %v1850_v1 = vand.u32 2147483648, %v1835_v20  ;;  %vm1844_vm14 = vweird.f32 %v1835_v20  ;;  %v1848_v23 = vand.u32 2147483647, %v1835_v20  ;;  %vm3492_vm8 = vmor %vm1768_vm4, %vm1769_vm5 }
 0x46a   : > { %v812_v61 = vpop.f32.mrf.mxu0  ;;  %v825_v43 = vpop.f32.mrf.mxu1  ;;  %v1765_v26 = vsub.f32 1.0, %v1764_v22  ;;  %v945_v55 = vsel %vm3476_vm3, %v944_v46, %v940_v40  ;;  %v2250_v39 = vmul.f32 -1.442695, %v913_v62 }
 0x46b   : > { %v1630_v0 = vpop.f32.mrf.mxu3  ;;  %v1851_v14 = vor.u32 1.1754944e-38, %v1850_v1  ;;  %vm1849_vm2 = vcmp.eq.f32.partialorder %v1848_v23, 8.507059e+37 }
 0x46c   : > { %v1766_v31 = vmul.f32 %v3438_v11, %v1765_v26  ;;  %v1631_v53 = vadd.f32 %v1630_v0, %v1612_v48 }
 0x46e   : > { %v2395_v5 = vpop.eup %2394  ;;  %v1767_v51 = vadd.f32 %v3438_v11, %v1766_v31 }
 0x46f   : > { %v2397_v52 = vpop.eup %2396  ;;  %v3444_v13 = vadd.f32 1.0, %v2395_v5 }
 0x470   : > { %v1840_v19 = vmul.f32 %v2397_v52, %v1835_v20  ;;  %vm1845_vm15 = vweird.f32 %v2397_v52  ;;  %v1775_v20 = vor.u32 1.1754944e-38, %v1774_v21  ;;  %v1771_v15 = vsel %vm3492_vm8, %v3438_v11, %v1767_v51  ;;  %v910_v11 = vld [vmem:[%s3915_s19 + $0x10] sm:$0xff] }
 0x471   : > { %2398 = vrcp.f32 %v3444_v13  ;;  %vm3464_vm1 = vmor %vm1844_vm14, %vm1845_vm15  ;;  %vm1920_vm6 = vweird.f32 %v3444_v13  ;;  %v1924_v33 = vand.u32 2147483647, %v3444_v13 }
 0x472   : > { %v1841_v27 = vsub.f32 1.0, %v1840_v19  ;;  %v877_v25 = vpop.f32.mrf.mxu0  ;;  %v890_v4 = vpop.f32.mrf.mxu1  ;;  %2400 = vtanh.f32 %v1631_v53  ;;  %v1776_v22 = vsel %vm1773_vm10, %v1775_v20, %v1771_v15 }
 0x473   : > { %v878_v10 = vadd.f32 %v877_v25, %v810_v42  ;;  %v891_v54 = vadd.f32 %v890_v4, %v823_v3  ;;  %v1926_v3 = vand.u32 2147483648, %v3444_v13  ;;  %vm1925_vm11 = vcmp.eq.f32.partialorder %v1924_v33, 8.507059e+37 }
 0x474   : > { %v1842_v30 = vmul.f32 %v2397_v52, %v1841_v27 }
 0x475   : > { %v902_v16 = vadd.f32 %v3407_v36, %v878_v10  ;;  %v3470_v47 = vadd.f32 %v3407_v36, %v891_v54  ;;  %v1927_v43 = vor.u32 1.1754944e-38, %v1926_v3  ;;  %v911_v10 = vld [vmem:[%s3915_s19 + $0x18] sm:$0xff] }
 0x476   : > { %v1843_v8 = vadd.f32 %v2397_v52, %v1842_v30 }
 0x477   : > { %v2399_v6 = vpop.eup %2398  ;;  %v906_v9 = vmax.f32 %v902_v16, 0.0  ;;  %v907_v4 = vmax.f32 %v3470_v47, 0.0 }
 0x478   : > { %v1847_v36 = vsel %vm3464_vm1, %v2397_v52, %v1843_v8  ;;  %v1916_v18 = vmul.f32 %v2399_v6, %v3444_v13  ;;  %vm1921_vm7 = vweird.f32 %v2399_v6  ;;  %v2401_v7 = vpop.eup %2400 }
 0x479   : > { %v1852_v56 = vsel %vm1849_vm2, %v1851_v14, %v1847_v36  ;;  %vm1922_vm9 = vmor %vm1920_vm6, %vm1921_vm7  ;;  %v1995_v13 = vmul.f32 %v2401_v7, %v1776_v22  ;;  %v914_v25 = vadd.f32 %v910_v11, %v906_v9  ;;  %v915_v0 = vadd.f32 %v911_v10, %v907_v4 }
 0x47a   : > { %v1917_v35 = vsub.f32 1.0, %v1916_v18  ;;  %v879_v41 = vpop.f32.mrf.mxu0  ;;  %v892_v59 = vpop.f32.mrf.mxu1  ;;  %v1979_v42 = vmul.f32 %v1852_v56, %v540_v63 }
 0x47b   : > { %v2251_v32 = vmul.f32 -1.442695, %v914_v25  ;;  %v2252_v47 = vmul.f32 -1.442695, %v915_v0 }
 0x47c   : > { %v1918_v60 = vmul.f32 %v2399_v6, %v1917_v35  ;;  %v1983_v34 = vadd.f32 %v1979_v42, %v945_v55 }
 0x47e   : > { %v1919_v61 = vadd.f32 %v2399_v6, %v1918_v60  ;;  %2011 = vst [vmem:[#allocation3] sm:$0xff] %v1983_v34  ;;  %2402 = vtanh.f32 %v1983_v34 }
 0x47f   : > { %2404 = vpow2.f32 %v2250_v39 }
 0x480   : > { %v1923_v2 = vsel %vm1922_vm9, %v2399_v6, %v1919_v61 }
 0x481   : > { %v1928_v52 = vsel %vm1925_vm11, %v1927_v43, %v1923_v2 }
 0x482   : > { %v1661_v5 = vpop.f32.mrf.mxu1 }
 0x484   : > { %v2403_v29 = vpop.eup %2402 }
 0x485   : > { %v1991_v24 = vmul.f32 %v2403_v29, %v1928_v52  ;;  %v2405_v26 = vpop.eup %2404 }
 0x486   : > { %v1642_v37 = vpop.f32.mrf.mxu0  ;;  %v3505_v28 = vadd.f32 1.0, %v2405_v26 }
 0x487   : > { %v1643_v19 = vadd.f32 %v1642_v37, %v3413_v57  ;;  %v1999_v27 = vadd.f32 %v1995_v13, %v1991_v24 }
 0x488   : > { %vm952_vm12 = vweird.f32 %v3505_v28  ;;  %v956_v2 = vand.u32 2147483647, %v3505_v28  ;;  %v958_v7 = vand.u32 2147483648, %v3505_v28 }
 0x489   : > { %v1662_v1 = vadd.f32 %v1661_v5, %v1643_v19  ;;  %v3510_v54 = vadd.f32 %v1999_v27, %v945_v55 }
 0x48a   : > { %v1663_v48 = vpop.f32.mrf.mxu1  ;;  %vm3560_vm0 = vcmp.eq.f32.partialorder %v956_v2, 8.507059e+37 }
 0x48b   : > { %v2286_v23 = vmul.f32 -1.442695, %v1662_v1  ;;  %2007 = vst [vmem:[#allocation2 + $0x10] sm:$0xff] %v3510_v54  ;;  %v1680_v21 = vpop.f32.mrf.mxu3 }
 0x48c   : > { %2015 = vst [vmem:[%s2682_s11] sm:$0xff] %v3510_v54  ;;  %v1718_v59 = vpop.f32.mrf.mxu2  ;;  %v1681_v60 = vadd.f32 %v1680_v21, %v3413_v57 }
 0x48d   : > { %2406 = vpow2.f32 %v2286_v23  ;;  %v1719_v15 = vadd.f32 %v1718_v59, %v3413_v57 }
 0x48e   : > { %v1644_v12 = vpop.f32.mrf.mxu0  ;;  %2408 = vrcp.f32 %v3505_v28 }
 0x48f   : > { %v1645_v30 = vadd.f32 %v1644_v12, %v3416_v44  ;;  %2410 = vpow2.f32 %v2251_v32 }
 0x491   : > { %v1664_v58 = vadd.f32 %v1663_v48, %v1645_v30 }
 0x492   : > { %v1666_v31 = vpop.f32.mrf.mxu1 }
 0x493   : > { %v2290_v14 = vmul.f32 -1.442695, %v1664_v58  ;;  %v2407_v16 = vpop.eup %2406  ;;  %v1682_v19 = vpop.f32.mrf.mxu3  ;;  %v541_v58 = vld [vmem:[#allocation3 + $0x18] sm:$0xff] }
 0x494   : > { %v3517_v8 = vpop.eup %2408  ;;  %v3519_v6 = vadd.f32 1.0, %v2407_v16  ;;  %v1720_v24 = vpop.f32.mrf.mxu2  ;;  %v1683_v12 = vadd.f32 %v1682_v19, %v3416_v44 }
 0x495   : > { %2412 = vpow2.f32 %v2290_v14  ;;  %v2411_v17 = vpop.eup %2410  ;;  %v948_v46 = vmul.f32 %v3517_v8, %v3505_v28  ;;  %vm953_vm13 = vweird.f32 %v3517_v8  ;;  %v959_v28 = vor.u32 1.1754944e-38, %v958_v7 }
 0x496   : > { %v1647_v62 = vpop.f32.mrf.mxu0  ;;  %2414 = vpow2.f32 %v2252_v47  ;;  %v3525_v51 = vadd.f32 1.0, %v2411_v17  ;;  %vm3548_vm14 = vmor %vm952_vm12, %vm953_vm13  ;;  %v1721_v30 = vadd.f32 %v1720_v24, %v3416_v44  ;;  %vm1783_vm4 = vweird.f32 %v3519_v6 }
 0x497   : > { %v1648_v63 = vadd.f32 %v1647_v62, %v3422_v50  ;;  %2416 = vrcp.f32 %v3519_v6  ;;  %v949_v35 = vsub.f32 1.0, %v948_v46 }
 0x499   : > { %v1667_v40 = vadd.f32 %v1666_v31, %v1648_v63  ;;  %v950_v55 = vmul.f32 %v3517_v8, %v949_v35 }
 0x49a   : > { %v1668_v49 = vpop.f32.mrf.mxu1 }
 0x49b   : > { %v2413_v53 = vpop.eup %2412  ;;  %v2294_v36 = vmul.f32 -1.442695, %v1667_v40  ;;  %v951_v43 = vadd.f32 %v3517_v8, %v950_v55  ;;  %v1685_v59 = vpop.f32.mrf.mxu3 }
 0x49c   : > { %v1836_v18 = vadd.f32 1.0, %v2413_v53  ;;  %v2415_v56 = vpop.eup %2414  ;;  %v1686_v7 = vadd.f32 %v1685_v59, %v3422_v50 }
 0x49d   : > { %2418 = vpow2.f32 %v2294_v36  ;;  %v3527_v42 = vpop.eup %2416  ;;  %v3530_v3 = vadd.f32 1.0, %v2415_v56  ;;  %v955_v25 = vsel %vm3548_vm14, %v3517_v8, %v951_v43  ;;  %vm967_vm14 = vweird.f32 %v3525_v51 }
 0x49e   : > { %2420 = vrcp.f32 %v1836_v18  ;;  %v1649_v41 = vpop.f32.mrf.mxu0  ;;  %v1779_v34 = vmul.f32 %v3527_v42, %v3519_v6  ;;  %v1863_v29 = vand.u32 2147483647, %v1836_v18  ;;  %v1865_v9 = vand.u32 2147483648, %v1836_v18 }
 0x49f   : > { %2422 = vrcp.f32 %v3525_v51  ;;  %v1650_v11 = vadd.f32 %v1649_v41, %v3446_v38  ;;  %vm1859_vm1 = vweird.f32 %v1836_v18  ;;  %v3577_v44 = vsel %vm3560_vm0, %v959_v28, %v955_v25 }
 0x4a0   : > { %2424 = vrcp.f32 %v3530_v3  ;;  %v1780_v57 = vsub.f32 1.0, %v1779_v34  ;;  %vm1864_vm3 = vcmp.eq.f32.partialorder %v1863_v29, 8.507059e+37  ;;  %v1866_v0 = vor.u32 1.1754944e-38, %v1865_v9 }
 0x4a1   : > { %v1669_v14 = vadd.f32 %v1668_v49, %v1650_v11  ;;  %vm1784_vm5 = vweird.f32 %v3527_v42  ;;  %vm982_vm0 = vweird.f32 %v3530_v3 }
 0x4a2   : > { %v1699_v61 = vpop.f32.mrf.mxu1  ;;  %v1781_v31 = vmul.f32 %v3527_v42, %v1780_v57  ;;  %vm3595_vm8 = vmor %vm1783_vm4, %vm1784_vm5 }
 0x4a3   : > { %v2419_v45 = vpop.eup %2418  ;;  %v1700_v13 = vadd.f32 %v1699_v61, %v1681_v60 }
 0x4a4   : > { %v2421_v33 = vpop.eup %2420  ;;  %v3536_v39 = vadd.f32 1.0, %v2419_v45  ;;  %v1782_v35 = vadd.f32 %v3527_v42, %v1781_v31  ;;  %v1789_v45 = vand.u32 2147483648, %v3519_v6  ;;  %v973_v31 = vand.u32 2147483648, %v3525_v51 }
 0x4a5   : > { %v1855_v20 = vmul.f32 %v2421_v33, %v1836_v18  ;;  %v3546_v5 = vpop.eup %2422  ;;  %vm1860_vm15 = vweird.f32 %v2421_v33  ;;  %v2287_v26 = vmul.f32 -1.442695, %v1700_v13 }
 0x4a6   : > { %2426 = vrcp.f32 %v3536_v39  ;;  %v1737_v22 = vpop.f32.mrf.mxu0  ;;  %v3555_v23 = vmul.f32 %v3546_v5, %v3525_v51  ;;  %v3564_v10 = vpop.eup %2424  ;;  %vm1861_vm2 = vmor %vm1859_vm1, %vm1860_vm15  ;;  %v1941_v34 = vand.u32 2147483648, %v3536_v39  ;;  %vm1935_vm7 = vweird.f32 %v3536_v39 }
 0x4a7   : > { %v1856_v52 = vsub.f32 1.0, %v1855_v20  ;;  %v1738_v27 = vadd.f32 %v1737_v22, %v1719_v15  ;;  %2428 = vpow2.f32 %v2287_v26  ;;  %v978_v63 = vmul.f32 %v3564_v10, %v3530_v3 }
 0x4a8   : > { %v964_v53 = vsub.f32 1.0, %v3555_v23  ;;  %2430 = vtanh.f32 %v1669_v14  ;;  %v1787_v20 = vand.u32 2147483647, %v3519_v6  ;;  %v1939_v2 = vand.u32 2147483647, %v3536_v39 }
 0x4a9   : > { %v1857_v1 = vmul.f32 %v2421_v33, %v1856_v52  ;;  %v2288_v62 = vmul.f32 -1.442695, %v1738_v27  ;;  %v979_v61 = vsub.f32 1.0, %v978_v63  ;;  %v1786_v52 = vsel %vm3595_vm8, %v3527_v42, %v1782_v35 }
 0x4aa   : > { %v1701_v8 = vpop.f32.mrf.mxu1  ;;  %v1790_v57 = vor.u32 1.1754944e-38, %v1789_v45  ;;  %v1942_v24 = vor.u32 1.1754944e-38, %v1941_v34  ;;  %vm1788_vm10 = vcmp.eq.f32.partialorder %v1787_v20, 8.507059e+37  ;;  %v965_v42 = vmul.f32 %v3546_v5, %v964_v53 }
 0x4ab   : > { %v1858_v48 = vadd.f32 %v2421_v33, %v1857_v1  ;;  %v1702_v17 = vadd.f32 %v1701_v8, %v1683_v12  ;;  %2432 = vpow2.f32 %v2288_v62  ;;  %vm1940_vm11 = vcmp.eq.f32.partialorder %v1939_v2, 8.507059e+37 }
 0x4ac   : > { %v3568_v32 = vpop.eup %2426  ;;  %v1791_v27 = vsel %vm1788_vm10, %v1790_v57, %v1786_v52  ;;  %v980_v23 = vmul.f32 %v3564_v10, %v979_v61  ;;  %v971_v14 = vand.u32 2147483647, %v3525_v51  ;;  %vm968_vm12 = vweird.f32 %v3546_v5 }
 0x4ad   : > { %v1862_v16 = vsel %vm1861_vm2, %v2421_v33, %v1858_v48  ;;  %v1931_v47 = vmul.f32 %v3568_v32, %v3536_v39  ;;  %v2291_v21 = vmul.f32 -1.442695, %v1702_v17  ;;  %v2429_v55 = vpop.eup %2428  ;;  %vm1936_vm6 = vweird.f32 %v3568_v32  ;;  %v1723_v33 = vpop.f32.mrf.mxu2  ;;  %vm3642_vm15 = vmor %vm967_vm14, %vm968_vm12 }
 0x4ae   : > { %v1867_v40 = vsel %vm1864_vm3, %v1866_v0, %v1862_v16  ;;  %v1739_v46 = vpop.f32.mrf.mxu0  ;;  %vm3603_vm9 = vmor %vm1935_vm7, %vm1936_vm6  ;;  %v3610_v37 = vadd.f32 1.0, %v2429_v55  ;;  %v1724_v6 = vadd.f32 %v1723_v33, %v3422_v50  ;;  %v2431_v19 = vpop.eup %2430  ;;  %v981_v8 = vadd.f32 %v3564_v10, %v980_v23  ;;  %v542_v23 = vld [vmem:[#allocation3 + $0x8] sm:$0xff] }
 0x4af   : > { %v1932_v36 = vsub.f32 1.0, %v1931_v47  ;;  %v1980_v18 = vmul.f32 %v1867_v40, %v541_v58  ;;  %v1740_v49 = vadd.f32 %v1739_v46, %v1721_v30  ;;  %2434 = vpow2.f32 %v2291_v21 }
 0x4b0   : > { %v1996_v30 = vmul.f32 %v2431_v19, %v1791_v27  ;;  %v966_v47 = vadd.f32 %v3546_v5, %v965_v42  ;;  %vm983_vm13 = vweird.f32 %v3564_v10  ;;  %v988_v40 = vand.u32 2147483648, %v3530_v3 }
 0x4b1   : > { %v1933_v56 = vmul.f32 %v3568_v32, %v1932_v36  ;;  %v1984_v41 = vadd.f32 %v1980_v18, %v3577_v44  ;;  %v2292_v60 = vmul.f32 -1.442695, %v1740_v49  ;;  %v2433_v11 = vpop.eup %2432  ;;  %v986_v46 = vand.u32 2147483647, %v3530_v3  ;;  %vm3655_vm1 = vmor %vm982_vm0, %vm983_vm13 }
 0x4b2   : > { %v1704_v13 = vpop.f32.mrf.mxu1  ;;  %v970_v51 = vsel %vm3642_vm15, %v3546_v5, %v966_v47  ;;  %vm972_vm2 = vcmp.eq.f32.partialorder %v971_v14, 8.507059e+37  ;;  %v974_v35 = vor.u32 1.1754944e-38, %v973_v31  ;;  %v985_v3 = vsel %vm3655_vm1, %v3564_v10, %v981_v8  ;;  %v543_v31 = vld [vmem:[#allocation3 + $0x10] sm:$0xff] }
 0x4b3   : > { %v1934_v15 = vadd.f32 %v3568_v32, %v1933_v56  ;;  %2436 = vtanh.f32 %v1984_v41  ;;  %2012 = vst [vmem:[#allocation3 + $0x18] sm:$0xff] %v1984_v41  ;;  %v1705_v29 = vadd.f32 %v1704_v13, %v1686_v7  ;;  %v1687_v56 = vpop.f32.mrf.mxu3  ;;  %v989_v55 = vor.u32 1.1754944e-38, %v988_v40 }
 0x4b4   : > { %2438 = vpow2.f32 %v2292_v60  ;;  %v3671_v34 = vsel %vm972_vm2, %v974_v35, %v970_v51  ;;  %vm987_vm3 = vcmp.eq.f32.partialorder %v986_v46, 8.507059e+37  ;;  %v1802_v13 = vand.u32 2147483647, %v3610_v37 }
 0x4b5   : > { %v1938_v39 = vsel %vm3603_vm9, %v3568_v32, %v1934_v15  ;;  %v2435_v26 = vpop.eup %2434  ;;  %v2295_v50 = vmul.f32 -1.442695, %v1705_v29  ;;  %2440 = vrcp.f32 %v3610_v37  ;;  %v3621_v32 = vadd.f32 1.0, %v2433_v11  ;;  %v1725_v59 = vpop.f32.mrf.mxu2 }
 0x4b6   : > { %v1742_v9 = vpop.f32.mrf.mxu0  ;;  %v1943_v4 = vsel %vm1940_vm11, %v1942_v24, %v1938_v39  ;;  %v3619_v28 = vadd.f32 1.0, %v2435_v26  ;;  %v1688_v15 = vadd.f32 %v1687_v56, %v3446_v38  ;;  %v3676_v61 = vsel %vm987_vm3, %v989_v55, %v985_v3 }
 0x4b7   : > { %v1743_v1 = vadd.f32 %v1742_v9, %v1724_v6  ;;  %2442 = vpow2.f32 %v2295_v50  ;;  %v1726_v7 = vadd.f32 %v1725_v59, %v3446_v38  ;;  %v1804_v19 = vand.u32 2147483648, %v3610_v37 }
 0x4b8   : > { %2444 = vrcp.f32 %v3619_v28  ;;  %v1878_v33 = vand.u32 2147483647, %v3619_v28  ;;  %v1880_v10 = vand.u32 2147483648, %v3619_v28  ;;  %vm1874_vm5 = vweird.f32 %v3619_v28 }
 0x4b9   : > { %v2437_v25 = vpop.eup %2436  ;;  %v2296_v48 = vmul.f32 -1.442695, %v1743_v1  ;;  %vm1798_vm8 = vweird.f32 %v3610_v37  ;;  %vm1813_vm12 = vweird.f32 %v3621_v32  ;;  %v1817_v35 = vand.u32 2147483647, %v3621_v32 }
 0x4ba   : > { %v1992_v12 = vmul.f32 %v2437_v25, %v1943_v4  ;;  %v2439_v0 = vpop.eup %2438  ;;  %v1706_v22 = vpop.f32.mrf.mxu1  ;;  %vm3685_vm6 = vcmp.eq.f32.partialorder %v1878_v33, 8.507059e+37  ;;  %v1881_v11 = vor.u32 1.1754944e-38, %v1880_v10 }
 0x4bb   : > { %2446 = vpow2.f32 %v2296_v48  ;;  %v3625_v16 = vadd.f32 1.0, %v2439_v0  ;;  %v3636_v63 = vpop.eup %2440  ;;  %v1707_v42 = vadd.f32 %v1706_v22, %v1688_v15 }
 0x4bc   : > { %v2000_v58 = vadd.f32 %v1996_v30, %v1992_v12  ;;  %2448 = vrcp.f32 %v3621_v32  ;;  %v1794_v41 = vmul.f32 %v3636_v63, %v3610_v37  ;;  %vm1799_vm10 = vweird.f32 %v3636_v63 }
 0x4bd   : > { %2450 = vrcp.f32 %v3625_v16  ;;  %v2443_v17 = vpop.eup %2442  ;;  %v1893_v24 = vand.u32 2147483647, %v3625_v16  ;;  %v1895_v1 = vand.u32 2147483648, %v3625_v16  ;;  %vm1889_vm11 = vweird.f32 %v3625_v16  ;;  %vm3727_vm2 = vmor %vm1798_vm8, %vm1799_vm10 }
 0x4be   : > { %v3631_v62 = vadd.f32 %v2000_v58, %v3577_v44  ;;  %v2445_v53 = vpop.eup %2444  ;;  %v3650_v36 = vadd.f32 1.0, %v2443_v17  ;;  %v1795_v52 = vsub.f32 1.0, %v1794_v41  ;;  %v1744_v25 = vpop.f32.mrf.mxu0  ;;  %vm1803_vm8 = vcmp.eq.f32.partialorder %v1802_v13, 8.507059e+37 }
 0x4bf   : > { %v1870_v21 = vmul.f32 %v2445_v53, %v3619_v28  ;;  %vm1875_vm4 = vweird.f32 %v2445_v53  ;;  %v1896_v14 = vor.u32 1.1754944e-38, %v1895_v1  ;;  %v1745_v8 = vadd.f32 %v1744_v25, %v1726_v7 }
 0x4c0   : > { %2008 = vst [vmem:[#allocation2] sm:$0xff] %v3631_v62  ;;  %2452 = vrcp.f32 %v3650_v36  ;;  %vm3691_vm7 = vmor %vm1874_vm5, %vm1875_vm4  ;;  %v1796_v48 = vmul.f32 %v3636_v63, %v1795_v52  ;;  %vm1894_vm14 = vcmp.eq.f32.partialorder %v1893_v24, 8.507059e+37  ;;  %v1956_v56 = vand.u32 2147483648, %v3650_v36 }
 0x4c1   : > { %2016 = vst [vmem:[%s2682_s11 + $0x8] sm:$0xff] %v3631_v62  ;;  %v2447_v49 = vpop.eup %2446  ;;  %v1871_v60 = vsub.f32 1.0, %v1870_v21  ;;  %vm1950_vm1 = vweird.f32 %v3650_v36  ;;  %v1954_v41 = vand.u32 2147483647, %v3650_v36  ;;  %v1805_v7 = vor.u32 1.1754944e-38, %v1804_v19 }
 0x4c2   : > { %v3666_v5 = vadd.f32 1.0, %v2447_v49  ;;  %v3668_v45 = vpop.eup %2448  ;;  %v1797_v46 = vadd.f32 %v3636_v63, %v1796_v48  ;;  %vm1818_vm10 = vcmp.eq.f32.partialorder %v1817_v35, 8.507059e+37 }
 0x4c3   : > { %v2451_v20 = vpop.eup %2450  ;;  %v1872_v43 = vmul.f32 %v2445_v53, %v1871_v60  ;;  %v1809_v6 = vmul.f32 %v3668_v45, %v3621_v32  ;;  %vm1814_vm0 = vweird.f32 %v3668_v45 }
 0x4c4   : > { %2454 = vrcp.f32 %v3666_v5  ;;  %v1885_v2 = vmul.f32 %v2451_v20, %v3625_v16  ;;  %vm1890_vm9 = vweird.f32 %v2451_v20  ;;  %v1801_v15 = vsel %vm3727_vm2, %v3636_v63, %v1797_v46 }
 0x4c5   : > { %v1873_v57 = vadd.f32 %v2445_v53, %v1872_v43  ;;  %v1810_v28 = vsub.f32 1.0, %v1809_v6  ;;  %vm1891_vm13 = vmor %vm1889_vm11, %vm1890_vm9  ;;  %2456 = vtanh.f32 %v1707_v42  ;;  %vm1965_vm5 = vweird.f32 %v3666_v5 }
 0x4c6   : > { %v1886_v29 = vsub.f32 1.0, %v1885_v2  ;;  %v3689_v9 = vpop.eup %2452  ;;  %v1957_v2 = vor.u32 1.1754944e-38, %v1956_v56  ;;  %v1969_v63 = vand.u32 2147483647, %v3666_v5  ;;  %vm1955_vm9 = vcmp.eq.f32.partialorder %v1954_v41, 8.507059e+37 }
 0x4c7   : > { %v1877_v26 = vsel %vm3691_vm7, %v2445_v53, %v1873_v57  ;;  %v1946_v50 = vmul.f32 %v3689_v9, %v3650_v36  ;;  %v1811_v53 = vmul.f32 %v3668_v45, %v1810_v28  ;;  %vm1951_vm15 = vweird.f32 %v3689_v9 }
 0x4c8   : > { %v1887_v27 = vmul.f32 %v2451_v20, %v1886_v29  ;;  %v1882_v12 = vsel %vm3685_vm6, %v1881_v11, %v1877_v26  ;;  %vm3735_vm3 = vmor %vm1950_vm1, %vm1951_vm15  ;;  %v1971_v36 = vand.u32 2147483648, %v3666_v5  ;;  %v1806_v19 = vsel %vm1803_vm8, %v1805_v7, %v1801_v15 }
 0x4c9   : > { %v1947_v0 = vsub.f32 1.0, %v1946_v50  ;;  %v1981_v47 = vmul.f32 %v1882_v12, %v542_v23  ;;  %v1812_v33 = vadd.f32 %v3668_v45, %v1811_v53  ;;  %vm3757_vm6 = vmor %vm1813_vm12, %vm1814_vm0  ;;  %vm1970_vm11 = vcmp.eq.f32.partialorder %v1969_v63, 8.507059e+37 }
 0x4ca   : > { %v3702_v4 = vpop.eup %2454  ;;  %v1888_v30 = vadd.f32 %v2451_v20, %v1887_v27  ;;  %v1972_v29 = vor.u32 1.1754944e-38, %v1971_v36 }
 0x4cb   : > { %v1961_v58 = vmul.f32 %v3702_v4, %v3666_v5  ;;  %v1948_v17 = vmul.f32 %v3689_v9, %v1947_v0  ;;  %v1985_v16 = vadd.f32 %v1981_v47, %v3671_v34  ;;  %v2457_v55 = vpop.eup %2456  ;;  %vm1966_vm4 = vweird.f32 %v3702_v4 }
 0x4cc   : > { %v1892_v40 = vsel %vm1891_vm13, %v2451_v20, %v1888_v30  ;;  %v1819_v20 = vand.u32 2147483648, %v3621_v32  ;;  %vm3762_vm7 = vmor %vm1965_vm5, %vm1966_vm4  ;;  %v1816_v32 = vsel %vm3757_vm6, %v3668_v45, %v1812_v33  ;;  %v1997_v38 = vmul.f32 %v2457_v55, %v1806_v19 }
 0x4cd   : > { %v1962_v44 = vsub.f32 1.0, %v1961_v58  ;;  %v1897_v51 = vsel %vm1894_vm14, %v1896_v14, %v1892_v40  ;;  %v1949_v49 = vadd.f32 %v3689_v9, %v1948_v17  ;;  %2458 = vtanh.f32 %v1985_v16  ;;  %2013 = vst [vmem:[#allocation3 + $0x8] sm:$0xff] %v1985_v16 }
 0x4ce   : > { %v1982_v21 = vmul.f32 %v1897_v51, %v543_v31  ;;  %2460 = vtanh.f32 %v1745_v8  ;;  %v1820_v37 = vor.u32 1.1754944e-38, %v1819_v20 }
 0x4cf   : > { %v1963_v18 = vmul.f32 %v3702_v4, %v1962_v44  ;;  %v1953_v43 = vsel %vm3735_vm3, %v3689_v9, %v1949_v49 }
 0x4d0   : > { %v1986_v59 = vadd.f32 %v1982_v21, %v3676_v61  ;;  %v1958_v57 = vsel %vm1955_vm9, %v1957_v2, %v1953_v43  ;;  %v1821_v24 = vsel %vm1818_vm10, %v1820_v37, %v1816_v32 }
 0x4d1   : > { %v1964_v10 = vadd.f32 %v3702_v4, %v1963_v18 }
 0x4d2   : > { %2462 = vtanh.f32 %v1986_v59  ;;  %2014 = vst [vmem:[#allocation3 + $0x10] sm:$0xff] %v1986_v59 }
 0x4d3   : > { %v2459_v6 = vpop.eup %2458  ;;  %v1968_v39 = vsel %vm3762_vm7, %v3702_v4, %v1964_v10 }
 0x4d4   : > { %v2461_v5 = vpop.eup %2460  ;;  %v1993_v9 = vmul.f32 %v2459_v6, %v1958_v57  ;;  %v1973_v1 = vsel %vm1970_vm11, %v1972_v29, %v1968_v39 }
 0x4d5   : > { %v1998_v26 = vmul.f32 %v2461_v5, %v1821_v24 }
 0x4d6   : > { %v2001_v11 = vadd.f32 %v1997_v38, %v1993_v9 }
 0x4d8   : > { %v2463_v13 = vpop.eup %2462  ;;  %v2005_v45 = vadd.f32 %v2001_v11, %v3671_v34 }
 0x4d9   : > { %v1994_v42 = vmul.f32 %v2463_v13, %v1973_v1 }
 0x4da   : > { %2009 = vst [vmem:[#allocation2 + $0x18] sm:$0xff] %v2005_v45 }
 0x4db   : > { %v2002_v27 = vadd.f32 %v1998_v26, %v1994_v42  ;;  %2017 = vst [vmem:[%s2682_s11 + $0x10] sm:$0xff] %v2005_v45 }
 0x4dc   : > { %2024 = sbr.rel (%p3431_p1) target bundleno = 1253 (0x4e5), region = 64 }
 0x4dd   : > { %v2006_v50 = vadd.f32 %v2002_v27, %v3676_v61 }
 0x4df   : > { %2010 = vst [vmem:[#allocation2 + $0x8] sm:$0xff] %v2006_v50 }
 0x4e0   : > { %2018 = vst [vmem:[%s2682_s11 + $0x18] sm:$0xff] %v2006_v50 }
 0x4e1   : > { %2025 = vst [vmem:[%s3949_s15] sm:$0xff] %v3510_v54 }
 0x4e2   : > { %2026 = vst [vmem:[%s3949_s15 + $0x8] sm:$0xff] %v3631_v62 }
 0x4e3   : > { %2027 = vst [vmem:[%s3949_s15 + $0x10] sm:$0xff] %v2005_v45 }
 0x4e4   : > { %2028 = vst [vmem:[%s3949_s15 + $0x18] sm:$0xff] %v2006_v50 }
 0x4e5 PF: > { %s3950_s30 = sld [smem:[#allocation10_spill]] }
 0x4e6   : > { %s3951_s27 = sld [smem:[#allocation7_spill]] }
 0x4e7   : > { %s3952_s28 = sld [smem:[#allocation8_spill]] }
 0x4e8   : > { %s3953_s29 = sld [smem:[#allocation9_spill]] }
 0x4e9   : > { %s3955_s9 = sld [smem:[#allocation12_spill]] }
 0x4ea   : > { %s3956_s10 = sld [smem:[#allocation13_spill]] }
 0x4eb   : > { %s18_s11 = sadd.s32 1, %s3950_s30   ;;  %s3954_s30 = sld [smem:[#allocation11_spill]] }
 0x4ec   : > { %p15_p2 = scmp.ge.s32.totalorder %s18_s11, 10  }
 0x4ee   :  { %17 = sbr.rel (!%p15_p2) target bundleno = 5 (0x5), region = 119 }

</bundles_post_ra>
